<compile_context>
chip_gen: v5e
topology: v5e:2x2
jax: 0.10.0
libtpu: 0.0.40
codegen_flags: <defaults>
</compile_context>

<pallas_src>
import jax
import jax.numpy as jnp
from jax.experimental import pallas as pl
from jax.experimental.pallas import tpu as pltpu


def _round_up(x, m):
    return (x + m - 1) // m * m


def cnn_kernel(x_ref, cw_ref, w1e_ref, b1_ref, w2t_ref, b2_ref, out_ref):
    """Fused Conv1d(1->4,k=3,p=1) + MaxPool1d(2) + flatten + Linear1/ReLU + Linear2/sigmoid.

    x_ref:   (TILE_N, L+3) f32   pair features, zero-padded (1 left, 2 right)
    cw_ref:  (4, 3)        f32   conv weights (SMEM scalars); conv bias folded into b1
    w1e_ref: (4, L, 128)   bf16  linear1 weights, row 2j of channel c = w1[c*(L//2)+j,:],
                                  odd rows zero (even-lane pick + channel-major flatten)
    b1_ref:  (1, 128)      f32   linear1 bias + folded conv-bias contribution
    w2t_ref: (1, 128)      bf16  linear2 weight, transposed
    b2_ref:  (1,)          f32   linear2 bias (SMEM scalar)
    out_ref: (1, TILE_N)   f32   sigmoid scores, pair index on the lane axis
    """
    xp = x_ref[...]
    tile_n = xp.shape[0]
    L = xp.shape[1] - 3
    H = b1_ref.shape[1]

    # Shifted views of the row: x0[l]=x[l-1], x1[l]=x[l], x2[l]=x[l+1], x3[l]=x[l+2]
    x0 = xp[:, 0:L]
    x1 = xp[:, 1:L + 1]
    x2 = xp[:, 2:L + 2]
    x3 = xp[:, 3:L + 3]

    acc = jnp.zeros((tile_n, H), jnp.float32)
    for c in range(4):                      # Conv1d out_channels = 4 (static unroll)
        w0 = cw_ref[c, 0]
        w1s = cw_ref[c, 1]
        w2s = cw_ref[c, 2]
        conv_c = w0 * x0 + w1s * x1 + w2s * x2      # conv[l]   (bias folded out)
        conv_n = w0 * x1 + w1s * x2 + w2s * x3      # conv[l+1]
        m_c = jnp.maximum(conv_c, conv_n)           # even lanes hold MaxPool(k=2,s=2)
        # pool-pick + flatten + linear1 fused: odd rows of w1e are zero
        acc = acc + jnp.dot(m_c.astype(jnp.bfloat16), w1e_ref[c],
                            preferred_element_type=jnp.float32)

    h = jnp.maximum(acc + b1_ref[...], 0.0)         # linear1 bias + ReLU (f32)
    h_bf = h.astype(jnp.bfloat16)

    # lane-dense logits: (1, 128) @ (TILE_N, 128)^T -> (1, TILE_N)
    logit = jnp.dot(w2t_ref[...], h_bf.T,
                    preferred_element_type=jnp.float32) + b2_ref[0]
    out_ref[...] = jax.nn.sigmoid(logit)


def ccl_asps_cnn_forward(drug_embs, protein_embs, index, params, tile_n=512):
    """CCL_ASPS 'CCL-ASPS' branch scoring head (Model_CNN.forward) with a Pallas hot path."""
    cw, cb, w1, b1, w2, b2 = params

    # glue: row gather + concat (== drug_embs[index[0]], protein_embs[index[1]])
    drug_sel = jnp.take(drug_embs, index[0, :], axis=0)
    prot_sel = jnp.take(protein_embs, index[1, :], axis=0)
    pair = jnp.concatenate([drug_sel, prot_sel], axis=-1).astype(jnp.float32)
    n, L = pair.shape
    half = L // 2
    H = w1.shape[1]                              # 128

    # Tile over pairs; lane-dense output blocks must be 128-aligned when tiled.
    n8 = _round_up(n, 8)
    if n8 <= tile_n:
        tile = n8                                # single tile (block == full array)
    else:
        tile = _round_up(tile_n, 128)
    n_pad = _round_up(n, tile)
    grid = (n_pad // tile,)

    # Single pad: rows -> n_pad; 1 zero column left / 2 right for the k=3 conv shifts.
    xpad = jnp.pad(pair, ((0, n_pad - n), (1, 2)))

    # Expanded linear1 weights: channel-major pooled slab lands on even lanes.
    w1_c = w1.reshape(4, half, H)                                 # (4, L/2, 128)
    w1e = jnp.zeros((4, L, H), jnp.float32).at[:, 0::2, :].set(w1_c)
    w1e = w1e.astype(jnp.bfloat16)

    # Fold conv bias: max(a+b, c+b) = max(a,c)+b, then linear through flatten+linear1.
    b1_eff = (b1 + jnp.einsum('c,cjk->k', cb, w1_c)).reshape(1, H).astype(jnp.float32)

    w2t = w2.reshape(H, 1).T.astype(jnp.bfloat16)                 # (1, 128)
    b2s = b2.reshape(1).astype(jnp.float32)
    cw32 = cw.astype(jnp.float32)

    out = pl.pallas_call(
        cnn_kernel,
        out_shape=jax.ShapeDtypeStruct((1, n_pad), jnp.float32),
        grid=grid,
        in_specs=[
            pl.BlockSpec((tile, L + 3), lambda i: (i, 0)),          # pair-feature tile
            pl.BlockSpec(memory_space=pltpu.MemorySpace.SMEM),      # conv weights (4,3)
            pl.BlockSpec((4, L, H), lambda i: (0, 0, 0)),           # w1e (VMEM-resident)
            pl.BlockSpec((1, H), lambda i: (0, 0)),                 # b1_eff
            pl.BlockSpec((1, H), lambda i: (0, 0)),                 # w2t
            pl.BlockSpec(memory_space=pltpu.MemorySpace.SMEM),      # b2 scalar
        ],
        out_specs=pl.BlockSpec((1, tile), lambda i: (0, i)),
        compiler_params=pltpu.CompilerParams(
            dimension_semantics=("parallel",),
            vmem_limit_bytes=32 * 1024 * 1024),
    )(xpad, cw32, w1e, b1_eff, w2t, b2s)

    return out[0, :n]                            # == output.view(-1)


def init_params(key, input_dim):
    """Deterministic init mirroring PyTorch default uniform bounds."""
    ks = jax.random.split(key, 6)
    bc = 1.0 / jnp.sqrt(3.0)                     # conv1: fan_in = 1 * 3
    cw = jax.random.uniform(ks[0], (4, 3), jnp.float32, -bc, bc)
    cb = jax.random.uniform(ks[1], (4,), jnp.float32, -bc, bc)
    b1b = 1.0 / jnp.sqrt(2.0 * input_dim)        # linear1: fan_in = 2 * input_dim
    w1 = jax.random.uniform(ks[2], (2 * input_dim, 128), jnp.float32, -b1b, b1b)
    b1 = jax.random.uniform(ks[3], (128,), jnp.float32, -b1b, b1b)
    b2b = 1.0 / jnp.sqrt(128.0)                  # linear2: fan_in = 128
    w2 = jax.random.uniform(ks[4], (128, 1), jnp.float32, -b2b, b2b)
    b2 = jax.random.uniform(ks[5], (1,), jnp.float32, -b2b, b2b)
    return cw, cb, w1, b1, w2, b2


def reference(drug_embs, protein_embs, index, params):
    """Pure-JAX f32 reference of Model_CNN.forward (dropout as identity)."""
    cw, cb, w1, b1, w2, b2 = params
    pair = jnp.concatenate([drug_embs[index[0]], protein_embs[index[1]]], -1)
    N, L = pair.shape
    xpad = jnp.pad(pair, ((0, 0), (1, 1)))
    convs = [cw[c, 0] * xpad[:, :L] + cw[c, 1] * xpad[:, 1:L + 1]
             + cw[c, 2] * xpad[:, 2:] + cb[c] for c in range(4)]
    pooled = [jnp.maximum(c_[:, 0::2], c_[:, 1::2]) for c_ in convs]
    flat = jnp.concatenate(pooled, axis=1)
    h = jax.nn.relu(flat @ w1 + b1)
    logit = h @ w2 + b2
    return jax.nn.sigmoid(logit).reshape(-1)


if __name__ == "__main__":
    key = jax.random.PRNGKey(0)
    kd, kp, ki1, ki2, kparam = jax.random.split(key, 5)

    n_drugs, n_proteins, n_pairs = 12, 10, 160
    drug_dim, protein_dim = 16, 16
    input_dim = drug_dim + protein_dim           # conv length 32, flat 64

    drug_embs = jax.random.normal(kd, (n_drugs, drug_dim), jnp.float32)
    protein_embs = jax.random.normal(kp, (n_proteins, protein_dim), jnp.float32)
    dti_index = jnp.stack([
        jax.random.randint(ki1, (n_pairs,), 0, n_drugs, dtype=jnp.int32),
        jax.random.randint(ki2, (n_pairs,), 0, n_proteins, dtype=jnp.int32),
    ])

    params = init_params(kparam, input_dim)

    # tile_n=128 at this demo size -> grid=(2,), exercises the tiled/padded path.
    out = ccl_asps_cnn_forward(drug_embs, protein_embs, dti_index, params, tile_n=128)
    out = jax.block_until_ready(out)

    ref = reference(drug_embs, protein_embs, dti_index, params)
    assert out.shape == (n_pairs,)
    # bf16 MXU operands with f32 accumulation: loosened tolerance vs pure-f32 reference.
    assert bool(jnp.allclose(out, ref, rtol=2e-2, atol=2e-2)), \
        float(jnp.max(jnp.abs(out - ref)))

    print("KERNEL_OK")
</pallas_src>

<mosaic_0001>
module attributes {stable_mosaic.version = 11 : i64} {
  func.func @cnn_kernel(%arg0: i32, %arg1: memref<128x35xf32, #tpu.memory_space<vmem>>, %arg2: memref<4x3xf32, #tpu.memory_space<smem>>, %arg3: memref<4x32x128xbf16, #tpu.memory_space<vmem>>, %arg4: memref<1x128xf32, #tpu.memory_space<vmem>>, %arg5: memref<1x128xbf16, #tpu.memory_space<vmem>>, %arg6: memref<1xf32, #tpu.memory_space<smem>>, %arg7: memref<1x128xf32, #tpu.memory_space<vmem>>) attributes {dimension_semantics = [#tpu.dimension_semantics<parallel>], iteration_bounds = array<i64: 2>, scalar_prefetch = 0 : i64, scratch_operands = 0 : i64, tpu.core_type = #tpu.core_type<tc>, window_params = [{transform_indices = @transform_0, window_bounds = array<i64: 128, 35>}, {transform_indices = @transform_1, window_bounds = array<i64: 4, 3>}, {pipeline_mode = #tpu.pipeline_mode<synchronous>, transform_indices = @transform_2, window_bounds = array<i64: 4, 32, 128>}, {pipeline_mode = #tpu.pipeline_mode<synchronous>, transform_indices = @transform_3, window_bounds = array<i64: 1, 128>}, {pipeline_mode = #tpu.pipeline_mode<synchronous>, transform_indices = @transform_4, window_bounds = array<i64: 1, 128>}, {transform_indices = @transform_5, window_bounds = array<i64: 1>}, {transform_indices = @transform_6, window_bounds = array<i64: 1, 128>}]} {
    %c0 = arith.constant 0 : index
    %c0_0 = arith.constant 0 : index
    %0 = vector.load %arg1[%c0, %c0_0] : memref<128x35xf32, #tpu.memory_space<vmem>>, vector<128x35xf32>
    %1 = vector.extract_strided_slice %0 {offsets = [0, 0], sizes = [128, 32], strides = [1, 1]} : vector<128x35xf32> to vector<128x32xf32>
    %2 = vector.extract_strided_slice %0 {offsets = [0, 1], sizes = [128, 32], strides = [1, 1]} : vector<128x35xf32> to vector<128x32xf32>
    %3 = vector.extract_strided_slice %0 {offsets = [0, 2], sizes = [128, 32], strides = [1, 1]} : vector<128x35xf32> to vector<128x32xf32>
    %4 = vector.extract_strided_slice %0 {offsets = [0, 3], sizes = [128, 32], strides = [1, 1]} : vector<128x35xf32> to vector<128x32xf32>
    %cst = arith.constant 0.000000e+00 : f32
    %5 = vector.broadcast %cst : f32 to vector<128x128xf32>
    %c0_1 = arith.constant 0 : index
    %c0_2 = arith.constant 0 : index
    %6 = memref.load %arg2[%c0_1, %c0_2] : memref<4x3xf32, #tpu.memory_space<smem>>
    %c0_3 = arith.constant 0 : index
    %c1 = arith.constant 1 : index
    %7 = memref.load %arg2[%c0_3, %c1] : memref<4x3xf32, #tpu.memory_space<smem>>
    %c0_4 = arith.constant 0 : index
    %c2 = arith.constant 2 : index
    %8 = memref.load %arg2[%c0_4, %c2] : memref<4x3xf32, #tpu.memory_space<smem>>
    %9 = vector.broadcast %6 : f32 to vector<128x32xf32>
    %10 = arith.mulf %9, %1 : vector<128x32xf32>
    %11 = vector.broadcast %7 : f32 to vector<128x32xf32>
    %12 = arith.mulf %11, %2 : vector<128x32xf32>
    %13 = arith.addf %10, %12 : vector<128x32xf32>
    %14 = vector.broadcast %8 : f32 to vector<128x32xf32>
    %15 = arith.mulf %14, %3 : vector<128x32xf32>
    %16 = arith.addf %13, %15 : vector<128x32xf32>
    %17 = vector.broadcast %6 : f32 to vector<128x32xf32>
    %18 = arith.mulf %17, %2 : vector<128x32xf32>
    %19 = vector.broadcast %7 : f32 to vector<128x32xf32>
    %20 = arith.mulf %19, %3 : vector<128x32xf32>
    %21 = arith.addf %18, %20 : vector<128x32xf32>
    %22 = vector.broadcast %8 : f32 to vector<128x32xf32>
    %23 = arith.mulf %22, %4 : vector<128x32xf32>
    %24 = arith.addf %21, %23 : vector<128x32xf32>
    %25 = arith.maximumf %16, %24 : vector<128x32xf32>
    %26 = arith.truncf %25 : vector<128x32xf32> to vector<128x32xbf16>
    %c0_5 = arith.constant 0 : index
    %c0_6 = arith.constant 0 : index
    %c0_7 = arith.constant 0 : index
    %27 = vector.load %arg3[%c0_5, %c0_6, %c0_7] : memref<4x32x128xbf16, #tpu.memory_space<vmem>>, vector<1x32x128xbf16>
    %28 = vector.shape_cast %27 : vector<1x32x128xbf16> to vector<32x128xbf16>
    %cst_8 = arith.constant dense<0.000000e+00> : vector<128x128xf32>
    %29 = tpu.matmul %26, %28, %cst_8 {dimension_numbers = #tpu.dot_dimension_numbers<[1], [0], [0], [1], [0, 0, 1, 1], [], []>} : vector<128x32xbf16>, vector<32x128xbf16>, vector<128x128xf32> -> vector<128x128xf32>
    %30 = arith.addf %5, %29 : vector<128x128xf32>
    %c1_9 = arith.constant 1 : index
    %c0_10 = arith.constant 0 : index
    %31 = memref.load %arg2[%c1_9, %c0_10] : memref<4x3xf32, #tpu.memory_space<smem>>
    %c1_11 = arith.constant 1 : index
    %c1_12 = arith.constant 1 : index
    %32 = memref.load %arg2[%c1_11, %c1_12] : memref<4x3xf32, #tpu.memory_space<smem>>
    %c1_13 = arith.constant 1 : index
    %c2_14 = arith.constant 2 : index
    %33 = memref.load %arg2[%c1_13, %c2_14] : memref<4x3xf32, #tpu.memory_space<smem>>
    %34 = vector.broadcast %31 : f32 to vector<128x32xf32>
    %35 = arith.mulf %34, %1 : vector<128x32xf32>
    %36 = vector.broadcast %32 : f32 to vector<128x32xf32>
    %37 = arith.mulf %36, %2 : vector<128x32xf32>
    %38 = arith.addf %35, %37 : vector<128x32xf32>
    %39 = vector.broadcast %33 : f32 to vector<128x32xf32>
    %40 = arith.mulf %39, %3 : vector<128x32xf32>
    %41 = arith.addf %38, %40 : vector<128x32xf32>
    %42 = vector.broadcast %31 : f32 to vector<128x32xf32>
    %43 = arith.mulf %42, %2 : vector<128x32xf32>
    %44 = vector.broadcast %32 : f32 to vector<128x32xf32>
    %45 = arith.mulf %44, %3 : vector<128x32xf32>
    %46 = arith.addf %43, %45 : vector<128x32xf32>
    %47 = vector.broadcast %33 : f32 to vector<128x32xf32>
    %48 = arith.mulf %47, %4 : vector<128x32xf32>
    %49 = arith.addf %46, %48 : vector<128x32xf32>
    %50 = arith.maximumf %41, %49 : vector<128x32xf32>
    %51 = arith.truncf %50 : vector<128x32xf32> to vector<128x32xbf16>
    %c1_15 = arith.constant 1 : index
    %c0_16 = arith.constant 0 : index
    %c0_17 = arith.constant 0 : index
    %52 = vector.load %arg3[%c1_15, %c0_16, %c0_17] : memref<4x32x128xbf16, #tpu.memory_space<vmem>>, vector<1x32x128xbf16>
    %53 = vector.shape_cast %52 : vector<1x32x128xbf16> to vector<32x128xbf16>
    %cst_18 = arith.constant dense<0.000000e+00> : vector<128x128xf32>
    %54 = tpu.matmul %51, %53, %cst_18 {dimension_numbers = #tpu.dot_dimension_numbers<[1], [0], [0], [1], [0, 0, 1, 1], [], []>} : vector<128x32xbf16>, vector<32x128xbf16>, vector<128x128xf32> -> vector<128x128xf32>
    %55 = arith.addf %30, %54 : vector<128x128xf32>
    %c2_19 = arith.constant 2 : index
    %c0_20 = arith.constant 0 : index
    %56 = memref.load %arg2[%c2_19, %c0_20] : memref<4x3xf32, #tpu.memory_space<smem>>
    %c2_21 = arith.constant 2 : index
    %c1_22 = arith.constant 1 : index
    %57 = memref.load %arg2[%c2_21, %c1_22] : memref<4x3xf32, #tpu.memory_space<smem>>
    %c2_23 = arith.constant 2 : index
    %c2_24 = arith.constant 2 : index
    %58 = memref.load %arg2[%c2_23, %c2_24] : memref<4x3xf32, #tpu.memory_space<smem>>
    %59 = vector.broadcast %56 : f32 to vector<128x32xf32>
    %60 = arith.mulf %59, %1 : vector<128x32xf32>
    %61 = vector.broadcast %57 : f32 to vector<128x32xf32>
    %62 = arith.mulf %61, %2 : vector<128x32xf32>
    %63 = arith.addf %60, %62 : vector<128x32xf32>
    %64 = vector.broadcast %58 : f32 to vector<128x32xf32>
    %65 = arith.mulf %64, %3 : vector<128x32xf32>
    %66 = arith.addf %63, %65 : vector<128x32xf32>
    %67 = vector.broadcast %56 : f32 to vector<128x32xf32>
    %68 = arith.mulf %67, %2 : vector<128x32xf32>
    %69 = vector.broadcast %57 : f32 to vector<128x32xf32>
    %70 = arith.mulf %69, %3 : vector<128x32xf32>
    %71 = arith.addf %68, %70 : vector<128x32xf32>
    %72 = vector.broadcast %58 : f32 to vector<128x32xf32>
    %73 = arith.mulf %72, %4 : vector<128x32xf32>
    %74 = arith.addf %71, %73 : vector<128x32xf32>
    %75 = arith.maximumf %66, %74 : vector<128x32xf32>
    %76 = arith.truncf %75 : vector<128x32xf32> to vector<128x32xbf16>
    %c2_25 = arith.constant 2 : index
    %c0_26 = arith.constant 0 : index
    %c0_27 = arith.constant 0 : index
    %77 = vector.load %arg3[%c2_25, %c0_26, %c0_27] : memref<4x32x128xbf16, #tpu.memory_space<vmem>>, vector<1x32x128xbf16>
    %78 = vector.shape_cast %77 : vector<1x32x128xbf16> to vector<32x128xbf16>
    %cst_28 = arith.constant dense<0.000000e+00> : vector<128x128xf32>
    %79 = tpu.matmul %76, %78, %cst_28 {dimension_numbers = #tpu.dot_dimension_numbers<[1], [0], [0], [1], [0, 0, 1, 1], [], []>} : vector<128x32xbf16>, vector<32x128xbf16>, vector<128x128xf32> -> vector<128x128xf32>
    %80 = arith.addf %55, %79 : vector<128x128xf32>
    %c3 = arith.constant 3 : index
    %c0_29 = arith.constant 0 : index
    %81 = memref.load %arg2[%c3, %c0_29] : memref<4x3xf32, #tpu.memory_space<smem>>
    %c3_30 = arith.constant 3 : index
    %c1_31 = arith.constant 1 : index
    %82 = memref.load %arg2[%c3_30, %c1_31] : memref<4x3xf32, #tpu.memory_space<smem>>
    %c3_32 = arith.constant 3 : index
    %c2_33 = arith.constant 2 : index
    %83 = memref.load %arg2[%c3_32, %c2_33] : memref<4x3xf32, #tpu.memory_space<smem>>
    %84 = vector.broadcast %81 : f32 to vector<128x32xf32>
    %85 = arith.mulf %84, %1 : vector<128x32xf32>
    %86 = vector.broadcast %82 : f32 to vector<128x32xf32>
    %87 = arith.mulf %86, %2 : vector<128x32xf32>
    %88 = arith.addf %85, %87 : vector<128x32xf32>
    %89 = vector.broadcast %83 : f32 to vector<128x32xf32>
    %90 = arith.mulf %89, %3 : vector<128x32xf32>
    %91 = arith.addf %88, %90 : vector<128x32xf32>
    %92 = vector.broadcast %81 : f32 to vector<128x32xf32>
    %93 = arith.mulf %92, %2 : vector<128x32xf32>
    %94 = vector.broadcast %82 : f32 to vector<128x32xf32>
    %95 = arith.mulf %94, %3 : vector<128x32xf32>
    %96 = arith.addf %93, %95 : vector<128x32xf32>
    %97 = vector.broadcast %83 : f32 to vector<128x32xf32>
    %98 = arith.mulf %97, %4 : vector<128x32xf32>
    %99 = arith.addf %96, %98 : vector<128x32xf32>
    %100 = arith.maximumf %91, %99 : vector<128x32xf32>
    %101 = arith.truncf %100 : vector<128x32xf32> to vector<128x32xbf16>
    %c3_34 = arith.constant 3 : index
    %c0_35 = arith.constant 0 : index
    %c0_36 = arith.constant 0 : index
    %102 = vector.load %arg3[%c3_34, %c0_35, %c0_36] : memref<4x32x128xbf16, #tpu.memory_space<vmem>>, vector<1x32x128xbf16>
    %103 = vector.shape_cast %102 : vector<1x32x128xbf16> to vector<32x128xbf16>
    %cst_37 = arith.constant dense<0.000000e+00> : vector<128x128xf32>
    %104 = tpu.matmul %101, %103, %cst_37 {dimension_numbers = #tpu.dot_dimension_numbers<[1], [0], [0], [1], [0, 0, 1, 1], [], []>} : vector<128x32xbf16>, vector<32x128xbf16>, vector<128x128xf32> -> vector<128x128xf32>
    %105 = arith.addf %80, %104 : vector<128x128xf32>
    %c0_38 = arith.constant 0 : index
    %c0_39 = arith.constant 0 : index
    %106 = vector.load %arg4[%c0_38, %c0_39] : memref<1x128xf32, #tpu.memory_space<vmem>>, vector<1x128xf32>
    %107 = vector.broadcast %106 : vector<1x128xf32> to vector<128x128xf32>
    %108 = arith.addf %105, %107 : vector<128x128xf32>
    %cst_40 = arith.constant 0.000000e+00 : f32
    %109 = vector.broadcast %cst_40 : f32 to vector<128x128xf32>
    %110 = arith.maximumf %108, %109 : vector<128x128xf32>
    %111 = arith.truncf %110 : vector<128x128xf32> to vector<128x128xbf16>
    %c0_41 = arith.constant 0 : index
    %c0_42 = arith.constant 0 : index
    %112 = vector.load %arg5[%c0_41, %c0_42] : memref<1x128xbf16, #tpu.memory_space<vmem>>, vector<1x128xbf16>
    %113 = tpu.transpose %111, [1, 0] : vector<128x128xbf16> -> vector<128x128xbf16>
    %cst_43 = arith.constant dense<0.000000e+00> : vector<1x128xf32>
    %114 = tpu.matmul %112, %113, %cst_43 {dimension_numbers = #tpu.dot_dimension_numbers<[1], [0], [0], [1], [0, 0, 1, 1], [], []>} : vector<1x128xbf16>, vector<128x128xbf16>, vector<1x128xf32> -> vector<1x128xf32>
    %c0_44 = arith.constant 0 : index
    %115 = memref.load %arg6[%c0_44] : memref<1xf32, #tpu.memory_space<smem>>
    %116 = vector.broadcast %115 : f32 to vector<1x128xf32>
    %117 = arith.addf %114, %116 : vector<1x128xf32>
    %118 = arith.negf %117 : vector<1x128xf32>
    %119 = math.exp %118 : vector<1x128xf32>
    %cst_45 = arith.constant 1.000000e+00 : f32
    %120 = vector.broadcast %cst_45 : f32 to vector<1x128xf32>
    %121 = arith.addf %120, %119 : vector<1x128xf32>
    %122 = arith.divf %120, %121 : vector<1x128xf32>
    %c0_46 = arith.constant 0 : index
    %c0_47 = arith.constant 0 : index
    %123 = vector.load %arg7[%c0_46, %c0_47] : memref<1x128xf32, #tpu.memory_space<vmem>>, vector<1x128xf32>
    tpu.vector_store %arg7[%c0_46, %c0_47], %122 {strides = array<i32>} : memref<1x128xf32, #tpu.memory_space<vmem>>, vector<1x128xf32>,
    return
  }
  func.func @transform_0(%arg0: i32) -> (i32, i32) {
    %c0_i32 = arith.constant 0 : i32
    %c0_i32_0 = arith.constant 0 : i32
    return %arg0, %c0_i32 : i32, i32
  }
  func.func @transform_1(%arg0: i32) -> (i32, i32) {
    %c0_i32 = arith.constant 0 : i32
    %c0_i32_0 = arith.constant 0 : i32
    %c0_i32_1 = arith.constant 0 : i32
    return %c0_i32, %c0_i32_0 : i32, i32
  }
  func.func @transform_2(%arg0: i32) -> (i32, i32, i32) {
    %c0_i32 = arith.constant 0 : i32
    %c0_i32_0 = arith.constant 0 : i32
    %c0_i32_1 = arith.constant 0 : i32
    %c0_i32_2 = arith.constant 0 : i32
    return %c0_i32, %c0_i32_0, %c0_i32_1 : i32, i32, i32
  }
  func.func @transform_3(%arg0: i32) -> (i32, i32) {
    %c0_i32 = arith.constant 0 : i32
    %c0_i32_0 = arith.constant 0 : i32
    %c0_i32_1 = arith.constant 0 : i32
    return %c0_i32, %c0_i32_0 : i32, i32
  }
  func.func @transform_4(%arg0: i32) -> (i32, i32) {
    %c0_i32 = arith.constant 0 : i32
    %c0_i32_0 = arith.constant 0 : i32
    %c0_i32_1 = arith.constant 0 : i32
    return %c0_i32, %c0_i32_0 : i32, i32
  }
  func.func @transform_5(%arg0: i32) -> i32 {
    %c0_i32 = arith.constant 0 : i32
    %c0_i32_0 = arith.constant 0 : i32
    return %c0_i32 : i32
  }
  func.func @transform_6(%arg0: i32) -> (i32, i32) {
    %c0_i32 = arith.constant 0 : i32
    %c0_i32_0 = arith.constant 0 : i32
    return %c0_i32, %arg0 : i32, i32
  }
}

</mosaic_0001>

<bundles_post_ra>
// kernel: tpu_custom_call.1
= control target key start
LH: loop header
LB: loop body
LE: loop exit
PB: predicated region body
PF: predicated region fallthrough
CT: control target
= control target key end

     0   :  { %s3640_s0 = inlined_call_operand.vmem [shape: f32[256,35], index: 0, kind: input, shape index: {}]   ;;  %s3641_s1 = inlined_call_operand.vmem [shape: f32[4,3], index: 1, kind: input, shape index: {}]   ;;  %s3642_s2 = inlined_call_operand.vmem [shape: bf16[4,32,128], index: 2, kind: input, shape index: {}]   ;;  %s3643_s3 = inlined_call_operand.vmem [shape: f32[1,128], index: 3, kind: input, shape index: {}]   ;;  %s3644_s4 = inlined_call_operand.vmem [shape: bf16[1,128], index: 4, kind: input, shape index: {}]   ;;  %s3645_s5 = inlined_call_operand.<no memory space> [shape: f32[1], index: 5, kind: input, shape index: {}]   ;;  %s3646_s6 = inlined_call_operand.hbm [shape: f32[1,256], index: 6, kind: output, shape index: {}]  }
   0x1   :  { %11 = sst [smem:[#allocation2]] %s3645_s5 }
   0x2   :  { %12 = vsyncpa [#allocation5], 0 }
   0x3   :  { %13 = vsyncpa [#allocation4], 0 }
   0x4   :  { %15 = vsyncpa [#allocation4 + $0x1], 0  ;;  %s2490_s23 = smov 0   ;;  %s2492_s24 = smov 0  }
   0x5   :  { %s2494_s25 = smov 0   ;;  %s2496_s26 = smov 0  }
   0x6 LB: > { %s2511_s5 = sadd.s32 4294967295, %s2447_s26   ;;  %s2043_s27 = sadd.s32 4294967294, %s2447_s26   ;;  %s2447_s26 = sphi %s2496_s26, %s3658_s26   ;;  %s2443_s25 = sphi %s2494_s25, %s3657_s25   ;;  %s2439_s24 = sphi %s2492_s24, %s3656_s24   ;;  %s2435_s23 = sphi %s2490_s23, %s3655_s23  }
   0x7   : > { %s2515_s28 = sadd.s32 1, %s2447_s26   ;;  %s159_s29 = sadd.s32 1, %s2443_s25 }
   0x8   : > { %s156_s30 = ssub.s32 %s2447_s26, %s2515_s28  ;;  %p169_p0 = scmp.ne.s32.totalorder %s2443_s25, %s2439_s24 }
   0x9   : > { %p157_p1 = scmp.eq.s32.totalorder %s156_s30, 0  ;;  %p170_p2 = scmp.eq.s32.totalorder %s2511_s5, 1 }
   0xa   : > { %p175_p3 = scmp.ne.s32.totalorder %s2439_s24, %s2435_s23  ;;  %p176_p4 = scmp.eq.s32.totalorder %s2043_s27, 1 }
   0xb   : > { %s2526_s7 = scalar_select %p157_p1, %s2443_s25, %s159_s29  }
   0xc   : > { %p2528_p5 = por %p170_p2, %p169_p0  ;;  %p2532_p6 = por %p176_p4, %p175_p3 }
   0xd   : > { %p2044_p7 = scmp.ge.s32.totalorder %s2447_s26, 1  ;;  %p183_p8 = scmp.lt.s32.totalorder %s2447_s26, 3 }
   0xe   : > { %p2163_p9 = scmp.eq.s32.totalorder %s2511_s5, 0  ;;  %s195_s12 = sshll.u32 %s3641_s1, 4  ;;  %s196_s12 = int_to_ptr.vmem [resolvable:$true] %s195_s12 }
   0xf   : > { %p184_p10 = pnand %p2044_p7, %p183_p8  ;;  %s2449_s13 = smov [#allocation3]  }
  0x11   : > { %p2155_p11 = pneg %p184_p10  ;;  %229 = sbr.rel (%p184_p10) target bundleno = 1057 (0x421), region = 44 }
  0x13   : > { %p2156_p12 = pnand %p2163_p9, %p2155_p11 }
  0x15   : > { %2158 = dma.vmem_to_smem (!%p2156_p12), %s196_s12, 64, %s2449_s13, [#allocation5]  }
  0x16   : > { %2426 = dma.done.wait (%p2163_p9), [#allocation5], 64  }
  0x17   : > { %2428 = vsyncadd (%p2163_p9), [#allocation5], 4294967232 }
  0x18   : > { %236 = sfence }
  0x19   : > { %s2049_s14 = sshll.u32 %s2511_s5, 4  ;;  %s2051_s15 = sld [smem:[#allocation3 + $0x1]]  ;;  %vm908_vm0 = vcmask 261120  }
  0x1a   : > { %p261_p13 = scmp.lt.s32.totalorder %s2049_s14, 31  ;;  %s2093_s16 = sld [smem:[#allocation3 + $0x101]] }
  0x1b   : > { %s2094_s17 = sld [smem:[#allocation3 + $0x102]]  ;;  %s2450_s22 = smov 127  }
  0x1c   : > { %s3660_s14 = smov (!%p261_p13, %s2049_s14), 31  ;;  %s2116_s27 = sld [smem:[#allocation3 + $0x181]] }
  0x1d   : > { %s2050_s18 = sshll.u32 %s3660_s14, 3  ;;  %s2451_s29 = smov 126  }
  0x1e   : > { %s2546_s21 = scalar_lea.vmem %s3640_s0, %s2050_s18  ;;  %s2054_s30 = sld [smem:[#allocation3 + $0x81]] }
  0x1f   : > { %v2548_v0 = vstv %s2051_s15  ;;  %v2551_v1 = vld [vmem:[%s2546_s21 + $0x10] sm:$0xff]  ;;  %v2554_v2 = vld [vmem:[%s2546_s21] sm:$0xff]  ;;  %v2557_v3 = vld [vmem:[%s2546_s21 + $0x8] sm:$0xff]  ;;  %s2117_s10 = sld [smem:[#allocation3 + $0x182]] }
  0x20   : > { %v306_v4 = vmul.f32 %v2548_v0, %v2551_v1  ;;  %v304_v5 = vmul.f32 %v2548_v0, %v2554_v2  ;;  %v2563_v6 = vstv %s2093_s16  ;;  %v305_v10 = vmul.f32 %v2548_v0, %v2557_v3  ;;  %s2052_s11 = sld [smem:[#allocation3 + $0x2]]  ;;  %v2627_v29 = vld [vmem:[%s2546_s21 + $0x18] sm:$0xff]  ;;  %v2671_v44 = vld [vmem:[%s2546_s21 + $0x20] sm:$0xff]  ;;  %v2678_v46 = vld [vmem:[%s2546_s21 + $0x28] sm:$0xff] }
  0x21   : > { %v1089_v7 = vmul.f32 %v2563_v6, %v2557_v3  ;;  %v2570_v8 = vstv %s2094_s17  ;;  %v1088_v9 = vmul.f32 %v2563_v6, %v2554_v2  ;;  %s2055_s12 = sld [smem:[#allocation3 + $0x82]]  ;;  %v1090_v28 = vmul.f32 %v2563_v6, %v2551_v1 }
  0x22   : > { %340 = vrot.lane.b32.xlu1 %v306_v4, %s2450_s22  ;;  %336 = vrot.lane.b32.xlu0 %v304_v5, %s2450_s22  ;;  %v1185_v11 = vmul.f32 %v2570_v8, %v2554_v2  ;;  %v2581_v12 = vstv %s2116_s27  ;;  %v1186_v14 = vmul.f32 %v2570_v8, %v2557_v3  ;;  %v1187_v30 = vmul.f32 %v2570_v8, %v2551_v1  ;;  %s2092_s13 = sld [smem:[#allocation3 + $0x100]] }
  0x23   : > { %1122 = vrot.lane.b32.xlu2 %v1089_v7, %s2450_s22  ;;  %v1496_v13 = vmul.f32 %v2581_v12, %v2554_v2  ;;  %v1497_v15 = vmul.f32 %v2581_v12, %v2557_v3  ;;  %v1091_v31 = vmul.f32 %v2563_v6, %v2627_v29  ;;  %v1188_v32 = vmul.f32 %v2570_v8, %v2627_v29  ;;  %s2115_s14 = sld [smem:[#allocation3 + $0x180]] }
  0x24   : > { %v2592_v16 = vstv %s2054_s30  ;;  %v1499_v33 = vmul.f32 %v2581_v12, %v2627_v29  ;;  %v1498_v34 = vmul.f32 %v2581_v12, %v2551_v1  ;;  %v307_v35 = vmul.f32 %v2548_v0, %v2627_v29  ;;  %s283_s15 = sld [smem:[#allocation3]]  ;;  %s258_s30 = sand.u32 1, %s2439_s24  }
  0x25   : > { %v2594_v17 = vstv %s2117_s10  ;;  %v611_v18 = vmul.f32 %v2592_v16, %v2557_v3  ;;  %v610_v19 = vmul.f32 %v2592_v16, %v2554_v2  ;;  %v613_v36 = vmul.f32 %v2592_v16, %v2627_v29  ;;  %s2053_s16 = sld [smem:[#allocation3 + $0x80]] }
  0x26   : > { %v1593_v20 = vmul.f32 %v2594_v17, %v2554_v2  ;;  %v2605_v21 = vstv %s2052_s11  ;;  %v1594_v23 = vmul.f32 %v2594_v17, %v2557_v3  ;;  %v612_v37 = vmul.f32 %v2592_v16, %v2551_v1  ;;  %s1928_s27 = sld [smem:[#allocation2]] }
  0x27   : > { %v401_v22 = vmul.f32 %v2605_v21, %v2554_v2  ;;  %v402_v24 = vmul.f32 %v2605_v21, %v2557_v3  ;;  %v2616_v25 = vstv %s2055_s12  ;;  %v1595_v38 = vmul.f32 %v2594_v17, %v2551_v1  ;;  %s1972_s12 = scalar_lea.hbm %s3646_s6, %s2511_s5 }
  0x28   : > { %v708_v26 = vmul.f32 %v2616_v25, %v2557_v3  ;;  %v707_v27 = vmul.f32 %v2616_v25, %v2554_v2  ;;  %v403_v39 = vmul.f32 %v2605_v21, %v2551_v1  ;;  %v1596_v40 = vmul.f32 %v2594_v17, %v2627_v29 }
  0x29   : > { %v404_v41 = vmul.f32 %v2605_v21, %v2627_v29  ;;  %v710_v42 = vmul.f32 %v2616_v25, %v2627_v29  ;;  %v709_v43 = vmul.f32 %v2616_v25, %v2551_v1  ;;  %v1092_v45 = vmul.f32 %v2563_v6, %v2671_v44 }
  0x2a   : > { %1120 = vrot.lane.b32.xlu1 %v1088_v9, %s2450_s22  ;;  %338 = vrot.lane.b32.xlu0 %v305_v10, %s2450_s22  ;;  %v1093_v47 = vmul.f32 %v2563_v6, %v2678_v46  ;;  %v1189_v48 = vmul.f32 %v2570_v8, %v2671_v44  ;;  %v1190_v49 = vmul.f32 %v2570_v8, %v2678_v46  ;;  %v2725_v10 = vstv %s2092_s13  ;;  %s259_s13 = scalar_lea.vmem [#allocation6], %s258_s30 }
  0x2b   : > { %1217 = vrot.lane.b32.xlu2 %v1185_v11, %s2451_s29  ;;  %v1500_v51 = vmul.f32 %v2581_v12, %v2671_v44  ;;  %v1501_v52 = vmul.f32 %v2581_v12, %v2678_v46  ;;  %v308_v53 = vmul.f32 %v2548_v0, %v2671_v44  ;;  %v309_v55 = vmul.f32 %v2548_v0, %v2678_v46 }
  0x2c   : > { %v614_v56 = vmul.f32 %v2592_v16, %v2671_v44  ;;  %v615_v57 = vmul.f32 %v2592_v16, %v2678_v46  ;;  %v1597_v59 = vmul.f32 %v2594_v17, %v2671_v44  ;;  %v1598_v60 = vmul.f32 %v2594_v17, %v2678_v46 }
  0x2d   : > { %v405_v61 = vmul.f32 %v2605_v21, %v2671_v44  ;;  %v406_v5 = vmul.f32 %v2605_v21, %v2678_v46  ;;  %v711_v7 = vmul.f32 %v2616_v25, %v2671_v44  ;;  %v712_v9 = vmul.f32 %v2616_v25, %v2678_v46 }
  0x32   : > { %1528 = vrot.lane.b32.xlu1 %v1496_v13, %s2450_s22  ;;  %1219 = vrot.lane.b32.xlu0 %v1186_v14, %s2451_s29  ;;  %v1071_v14 = vmul.f32 %v2725_v10, %v2554_v2 }
  0x33   : > { %1530 = vrot.lane.b32.xlu2 %v1497_v15, %s2450_s22 }
  0x3a   : > { %644 = vrot.lane.b32.xlu1 %v611_v18, %s2450_s22  ;;  %642 = vrot.lane.b32.xlu0 %v610_v19, %s2450_s22  ;;  %v1072_v18 = vmul.f32 %v2725_v10, %v2557_v3 }
  0x3b   : > { %1625 = vrot.lane.b32.xlu2 %v1593_v20, %s2451_s29 }
  0x42   : > { %433 = vrot.lane.b32.xlu1 %v401_v22, %s2451_s29  ;;  %1627 = vrot.lane.b32.xlu0 %v1594_v23, %s2451_s29 }
  0x43   : > { %435 = vrot.lane.b32.xlu2 %v402_v24, %s2451_s29 }
  0x4a   : > { %741 = vrot.lane.b32.xlu1 %v708_v26, %s2451_s29  ;;  %739 = vrot.lane.b32.xlu0 %v707_v27, %s2451_s29 }
  0x4b   : > { %1124 = vrot.lane.b32.xlu2 %v1090_v28, %s2450_s22 }
  0x52   : > { %1221 = vrot.lane.b32.xlu1 %v1187_v30, %s2451_s29  ;;  %1126 = vrot.lane.b32.xlu0 %v1091_v31, %s2450_s22  ;;  %v2743_v30 = vstv %s2115_s14  ;;  %v2745_v31 = vstv %s283_s15  ;;  %s1974_s14 = sshll.u32 %s259_s13, 4  ;;  %s1976_s15 = sshll.u32 %s1972_s12, 4  ;;  %s1975_s14 = int_to_ptr.vmem [resolvable:$true] %s1974_s14  ;;  %s1977_s15 = int_to_ptr.hbm [resolvable:$true] %s1976_s15 }
  0x53   : > { %1223 = vrot.lane.b32.xlu2 %v1188_v32, %s2451_s29  ;;  %s2395_s5 = sshra.s32 %s1977_s15, 4  ;;  %s2396_s5 = int_to_ptr.hbm [resolvable:$true] %s2395_s5 }
  0x54   : > { %s2397_s17 = scalar_lea.hbm %s2396_s5, 1  ;;  %p2402_p3 = scmp.lt.s32.totalorder %s2396_s5, %s3646_s6 }
  0x55   : > { %p2398_p0 = scmp.ne.s32.totalorder %s2396_s5, %s2397_s17 }
  0x57   : > { %p2399_p1 = pnand %p2398_p0, %p2528_p5 }
  0x59   : > { %p2400_p2 = pneg %p2399_p1 }
  0x5a   : > { %1534 = vrot.lane.b32.xlu1 %v1499_v33, %s2450_s22  ;;  %1532 = vrot.lane.b32.xlu0 %v1498_v34, %s2450_s22  ;;  %v288_v34 = vmul.f32 %v2745_v31, %v2557_v3 }
  0x5b   : > { %342 = vrot.lane.b32.xlu2 %v307_v35, %s2450_s22  ;;  %v1479_v35 = vmul.f32 %v2743_v30, %v2554_v2 }
  0x62   : > { %648 = vrot.lane.b32.xlu1 %v613_v36, %s2450_s22  ;;  %646 = vrot.lane.b32.xlu0 %v612_v37, %s2450_s22  ;;  %v1480_v36 = vmul.f32 %v2743_v30, %v2557_v3  ;;  %v287_v37 = vmul.f32 %v2745_v31, %v2554_v2 }
  0x63   : > { %1629 = vrot.lane.b32.xlu2 %v1595_v38, %s2451_s29 }
  0x6a   : > { %437 = vrot.lane.b32.xlu1 %v403_v39, %s2451_s29  ;;  %1631 = vrot.lane.b32.xlu0 %v1596_v40, %s2451_s29 }
  0x6b   : > { %439 = vrot.lane.b32.xlu2 %v404_v41, %s2451_s29 }
  0x72   : > { %745 = vrot.lane.b32.xlu1 %v710_v42, %s2451_s29  ;;  %743 = vrot.lane.b32.xlu0 %v709_v43, %s2451_s29  ;;  %v2757_v43 = vstv %s2053_s16  ;;  %s1964_s16 = scalar_lea.sflag [#allocation4], %s258_s30 }
  0x73   : > { %1128 = vrot.lane.b32.xlu2 %v1092_v45, %s2450_s22 }
  0x7a   : > { %1130 = vrot.lane.b32.xlu0 %v1093_v47, %s2450_s22  ;;  %1225 = vrot.lane.b32.xlu1 %v1189_v48, %s2451_s29 }
  0x7b   : > { %1227 = vrot.lane.b32.xlu2 %v1190_v49, %s2451_s29 }
  0x7d   : > { %v1123_v50 = vpop.permute.xlu2 %1122 }
  0x7e   : > { %v1169_v20 = vadd.f32 %v1123_v50, %v1072_v18 }
  0x82   : > { %1536 = vrot.lane.b32.xlu0 %v1500_v51, %s2450_s22  ;;  %1538 = vrot.lane.b32.xlu1 %v1501_v52, %s2450_s22  ;;  %v594_v52 = vmul.f32 %v2757_v43, %v2557_v3  ;;  %v2783_v3 = vld [vmem:[%s2546_s21 + $0x38] sm:$0xff] }
  0x83   : > { %344 = vrot.lane.b32.xlu2 %v308_v53, %s2450_s22  ;;  %v593_v53 = vmul.f32 %v2757_v43, %v2554_v2 }
  0x85   : > { %v1218_v54 = vpop.permute.xlu2 %1217 }
  0x8a   : > { %346 = vrot.lane.b32.xlu0 %v309_v55, %s2450_s22  ;;  %650 = vrot.lane.b32.xlu1 %v614_v56, %s2450_s22 }
  0x8b   : > { %652 = vrot.lane.b32.xlu2 %v615_v57, %s2450_s22  ;;  %v2780_v57 = vld [vmem:[%s2546_s21 + $0x30] sm:$0xff] }
  0x8c   : > { %v1502_v18 = vmul.f32 %v2581_v12, %v2780_v57 }
  0x8d   : > { %v1531_v58 = vpop.permute.xlu2 %1530 }
  0x8e   : > { %v1577_v41 = vadd.f32 %v1531_v58, %v1480_v36  ;;  %v1599_v36 = vmul.f32 %v2594_v17, %v2780_v57 }
  0x92   : > { %1633 = vrot.lane.b32.xlu0 %v1597_v59, %s2451_s29  ;;  %1635 = vrot.lane.b32.xlu1 %v1598_v60, %s2451_s29 }
  0x93   : > { %441 = vrot.lane.b32.xlu2 %v405_v61, %s2451_s29 }
  0x94   : > { %v2717_v62 = vpop.permute.xlu1 %340  ;;  %v337_v63 = vpop.permute.xlu0 %336 }
  0x95   : > { %v1626_v4 = vpop.permute.xlu2 %1625  ;;  %v384_v42 = vadd.f32 %v337_v63, %v287_v37 }
  0x9a   : > { %443 = vrot.lane.b32.xlu0 %v406_v5, %s2451_s29  ;;  %747 = vrot.lane.b32.xlu1 %v711_v7, %s2451_s29  ;;  %v1095_v5 = vmul.f32 %v2563_v6, %v2783_v3 }
  0x9b   : > { %749 = vrot.lane.b32.xlu2 %v712_v9, %s2451_s29 }
  0x9c   : > { %v1121_v11 = vpop.permute.xlu1 %1120  ;;  %v339_v13 = vpop.permute.xlu0 %338 }
  0x9d   : > { %v436_v15 = vpop.permute.xlu2 %435  ;;  %v1168_v19 = vadd.f32 %v1121_v11, %v1071_v14  ;;  %v385_v39 = vadd.f32 %v339_v13, %v288_v34  ;;  %v1192_v14 = vmul.f32 %v2570_v8, %v2783_v3  ;;  %v617_v34 = vmul.f32 %v2592_v16, %v2783_v3 }
  0x9f   : > { %v2734_v24 = vadd.f32 %v1218_v54, %v1168_v19  ;;  %v2759_v48 = vadd.f32 %v436_v15, %v385_v39  ;;  %v1191_v15 = vmul.f32 %v2570_v8, %v2780_v57 }
  0xa4   : > { %v1529_v22 = vpop.permute.xlu1 %1528  ;;  %v1220_v23 = vpop.permute.xlu0 %1219 }
  0xa5   : > { %v2736_v26 = vadd.f32 %v1220_v23, %v1169_v20  ;;  %v2738_v27 = vpop.permute.xlu2 %1124  ;;  %v1576_v40 = vadd.f32 %v1529_v22, %v1479_v35  ;;  %v310_v22 = vmul.f32 %v2548_v0, %v2780_v57  ;;  %v1503_v23 = vmul.f32 %v2581_v12, %v2783_v3 }
  0xa6   : > { %v616_v35 = vmul.f32 %v2592_v16, %v2780_v57 }
  0xa7   : > { %v2201_v28 = vpack.i.bf16 %v2736_v26, %v2734_v24  ;;  %v2761_v49 = vadd.f32 %v1626_v4, %v1576_v40  ;;  %v1094_v4 = vmul.f32 %v2563_v6, %v2780_v57  ;;  %v1073_v40 = vmul.f32 %v2725_v10, %v2551_v1 }
  0xa9   : > { %2202 = vrot.lane.b32.xlu0 %v2201_v28, %s2450_s22 }
  0xac   : > { %v645_v32 = vpop.permute.xlu1 %644  ;;  %v643_v33 = vpop.permute.xlu0 %642 }
  0xad   : > { %v2755_v38 = vpop.permute.xlu2 %1223  ;;  %v691_v58 = vadd.f32 %v645_v32, %v594_v52  ;;  %v690_v59 = vadd.f32 %v643_v33, %v593_v53  ;;  %v311_v32 = vmul.f32 %v2548_v0, %v2783_v3  ;;  %v408_v52 = vmul.f32 %v2605_v21, %v2783_v3 }
  0xae   : > { %v1170_v53 = vadd.f32 %v2738_v27, %v1073_v40 }
  0xb4   : > { %v434_v45 = vpop.permute.xlu1 %433  ;;  %v1628_v47 = vpop.permute.xlu0 %1627 }
  0xb5   : > { %v2763_v50 = vadd.f32 %v434_v45, %v384_v42  ;;  %v2765_v51 = vadd.f32 %v1628_v47, %v1577_v41  ;;  %v2777_v56 = vpop.permute.xlu2 %342  ;;  %v1074_v41 = vmul.f32 %v2725_v10, %v2627_v29  ;;  %v407_v45 = vmul.f32 %v2605_v21, %v2780_v57 }
  0xb6   : > { %v1600_v47 = vmul.f32 %v2594_v17, %v2783_v3 }
  0xb7   : > { %v2211_v54 = vpack.i.bf16 %v2759_v48, %v2763_v50  ;;  %v2206_v55 = vpack.i.bf16 %v2765_v51, %v2761_v49 }
  0xb9   : > { %2207 = vrot.lane.b32.xlu1 %v2206_v55, %s2450_s22  ;;  %2212 = vrot.lane.b32.xlu2 %v2211_v54, %s2450_s22 }
  0xbc   : > { %v742_v60 = vpop.permute.xlu1 %741  ;;  %v740_v2 = vpop.permute.xlu0 %739 }
  0xbd   : > { %v2785_v61 = vadd.f32 %v742_v60, %v691_v58  ;;  %v2787_v63 = vadd.f32 %v740_v2, %v690_v59  ;;  %v1630_v9 = vpop.permute.xlu2 %1629  ;;  %v290_v59 = vmul.f32 %v2745_v31, %v2627_v29  ;;  %v1482_v60 = vmul.f32 %v2743_v30, %v2627_v29 }
  0xbe   : > { %v1481_v2 = vmul.f32 %v2743_v30, %v2551_v1 }
  0xbf   : > { %v2216_v7 = vpack.i.bf16 %v2785_v61, %v2787_v63 }
  0xc1   : > { %1132 = vrot.lane.b32.xlu1 %v1094_v4, %s2450_s22  ;;  %2217 = vrot.lane.b32.xlu0 %v2216_v7, %s2450_s22  ;;  %v595_v7 = vmul.f32 %v2757_v43, %v2551_v1 }
  0xc2   : > { %1134 = vrot.lane.b32.xlu2 %v1095_v5, %s2450_s22  ;;  %v596_v5 = vmul.f32 %v2757_v43, %v2627_v29 }
  0xc4   : > { %v1222_v11 = vpop.permute.xlu1 %1221  ;;  %v1127_v13 = vpop.permute.xlu0 %1126 }
  0xc5   : > { %v440_v28 = vpop.permute.xlu2 %439  ;;  %v1171_v54 = vadd.f32 %v1127_v13, %v1074_v41  ;;  %v2849_v27 = vadd.f32 %v1222_v11, %v1170_v53  ;;  %v713_v11 = vmul.f32 %v2616_v25, %v2780_v57  ;;  %v2897_v41 = vld [vmem:[%s2546_s21 + $0x48] sm:$0xff] }
  0xc7   : > { %v2852_v4 = vadd.f32 %v2755_v38, %v1171_v54 }
  0xc9   : > { %1231 = vrot.lane.b32.xlu1 %v1192_v14, %s2451_s29  ;;  %1229 = vrot.lane.b32.xlu0 %v1191_v15, %s2451_s29  ;;  %v289_v14 = vmul.f32 %v2745_v31, %v2551_v1  ;;  %v714_v15 = vmul.f32 %v2616_v25, %v2783_v3  ;;  %v2221_v29 = vpack.i.bf16 %v2852_v4, %v2849_v27 }
  0xca   : > { %1540 = vrot.lane.b32.xlu2 %v1502_v18, %s2450_s22  ;;  %v387_v18 = vadd.f32 %v2777_v56, %v290_v59  ;;  %v2141_v59 = vld [vmem:[%s3642_s2] sm:$0xff] }
  0xcc   : > { %v1533_v19 = vpop.permute.xlu0 %1532  ;;  %v1535_v20 = vpop.permute.xlu1 %1534  ;;  %v2873_v56 = vadd.f32 %v440_v28, %v387_v18 }
  0xcd   : > { %v2822_v39 = vpop.permute.xlu2 %1128  ;;  %v1579_v38 = vadd.f32 %v1535_v20, %v1482_v60 }
  0xd1   : > { %348 = vrot.lane.b32.xlu1 %v310_v22, %s2450_s22  ;;  %1542 = vrot.lane.b32.xlu0 %v1503_v23, %s2450_s22  ;;  %v1578_v22 = vadd.f32 %v1533_v19, %v1481_v2  ;;  %v2146_v2 = vld [vmem:[%s3642_s2 + $0x28] sm:$0xff] }
  0xd2   : > { %350 = vrot.lane.b32.xlu2 %v311_v32, %s2450_s22  ;;  %1416 = vmatpush.bf16.msra.mxu2 %v2146_v2 }
  0xd3   : > { %v2871_v1 = vadd.f32 %v1630_v9, %v1578_v22 }
  0xd4   : > { %v647_v33 = vpop.permute.xlu0 %646  ;;  %v649_v37 = vpop.permute.xlu1 %648 }
  0xd5   : > { %v2840_v58 = vpop.permute.xlu2 %1227  ;;  %v693_v23 = vadd.f32 %v649_v37, %v596_v5  ;;  %v692_v32 = vadd.f32 %v647_v33, %v595_v7  ;;  %3651 = vst [vmem:[#allocation9_spill] sm:$0xff] %v2871_v1  ;;  %v1194_v7 = vmul.f32 %v2570_v8, %v2897_v41 }
  0xd9   : > { %656 = vrot.lane.b32.xlu1 %v617_v34, %s2450_s22  ;;  %654 = vrot.lane.b32.xlu0 %v616_v35, %s2450_s22  ;;  %v386_v34 = vadd.f32 %v2717_v62, %v289_v14  ;;  %v1505_v14 = vmul.f32 %v2581_v12, %v2897_v41 }
  0xda   : > { %1637 = vrot.lane.b32.xlu2 %v1599_v36, %s2451_s29 }
  0xdc   : > { %v1632_v42 = vpop.permute.xlu0 %1631  ;;  %v438_v55 = vpop.permute.xlu1 %437 }
  0xdd   : > { %v2875_v19 = vadd.f32 %v438_v55, %v386_v34  ;;  %v2877_v20 = vadd.f32 %v1632_v42, %v1579_v38  ;;  %v2879_v33 = vpop.permute.xlu2 %344  ;;  %v2900_v42 = vld [vmem:[%s2546_s21 + $0x40] sm:$0xff]  ;;  %v313_v38 = vmul.f32 %v2548_v0, %v2897_v41  ;;  %v2148_v34 = vld [vmem:[%s3642_s2 + $0x38] sm:$0xff] }
  0xde   : > { %v1096_v53 = vmul.f32 %v2563_v6, %v2900_v42  ;;  %v1193_v55 = vmul.f32 %v2570_v8, %v2900_v42  ;;  %v1504_v5 = vmul.f32 %v2581_v12, %v2900_v42  ;;  %v312_v22 = vmul.f32 %v2548_v0, %v2900_v42  ;;  %1824 = vmatpush.bf16.msra.mxu3 %v2148_v34 }
  0xdf   : > { %3652 = vst [vmem:[#allocation10_spill] sm:$0xff] %v2877_v20  ;;  %v2231_v40 = vpack.i.bf16 %v2873_v56, %v2875_v19  ;;  %v2226_v9 = vpack.i.bf16 %v2877_v20, %v2871_v1 }
  0xe1   : > { %445 = vrot.lane.b32.xlu1 %v407_v45, %s2451_s29  ;;  %1639 = vrot.lane.b32.xlu0 %v1600_v47, %s2451_s29  ;;  %v2142_v45 = vld [vmem:[%s3642_s2 + $0x8] sm:$0xff] }
  0xe2   : > { %447 = vrot.lane.b32.xlu2 %v408_v52, %s2451_s29  ;;  %1024 = vmatpush.bf16.msra.mxu1 %v2142_v45  ;;  %v1097_v52 = vmul.f32 %v2563_v6, %v2897_v41  ;;  %v2147_v45 = vld [vmem:[%s3642_s2 + $0x30] sm:$0xff] }
  0xe3   : > { %1825 = vmatpush.bf16.msra.mxu3 %v2147_v45 }
  0xe4   : > { %v744_v13 = vpop.permute.xlu0 %743  ;;  %v746_v35 = vpop.permute.xlu1 %745 }
  0xe5   : > { %v2881_v62 = vadd.f32 %v746_v35, %v693_v23  ;;  %v2883_v36 = vadd.f32 %v744_v13, %v692_v32  ;;  %v2911_v54 = vpop.permute.xlu2 %652  ;;  %v618_v23 = vmul.f32 %v2592_v16, %v2900_v42 }
  0xe6   : > { %1025 = vmatpush.bf16.msra.mxu1 %v2141_v59  ;;  %v1076_v59 = vmul.f32 %v2725_v10, %v2678_v46 }
  0xe7   : > { %v2236_v28 = vpack.i.bf16 %v2881_v62, %v2883_v36 }
  0xe9   : > { %753 = vrot.lane.b32.xlu1 %v714_v15, %s2451_s29  ;;  %751 = vrot.lane.b32.xlu0 %v713_v11, %s2451_s29  ;;  %v2145_v15 = vld [vmem:[%s3642_s2 + $0x20] sm:$0xff] }
  0xea   : > { %2222 = vrot.lane.b32.xlu2 %v2221_v29, %s2450_s22  ;;  %1417 = vmatpush.bf16.msra.mxu2 %v2145_v15 }
  0xec   : > { %v2885_v37 = vpop.permute.xlu0 %1130  ;;  %v2918_v60 = vpop.permute.xlu1 %1225 }
  0xed   : > { %v2937_v11 = vpop.permute.xlu2 %441 }
  0xf1   : > { %2232 = vrot.lane.b32.xlu1 %v2231_v40, %s2450_s22  ;;  %2227 = vrot.lane.b32.xlu0 %v2226_v9, %s2450_s22  ;;  %v1601_v40 = vmul.f32 %v2594_v17, %v2900_v42  ;;  %v619_v9 = vmul.f32 %v2592_v16, %v2897_v41 }
  0xf2   : > { %2237 = vrot.lane.b32.xlu2 %v2236_v28, %s2450_s22  ;;  %v1602_v28 = vmul.f32 %v2594_v17, %v2897_v41 }
  0xf4   : > { %v2905_v47 = vpop.permute.xlu0 %1536  ;;  %v1539_v18 = vpop.permute.xlu1 %1538 }
  0xf5   : > { %v2950_v29 = vpop.permute.xlu2 %749 }
  0xf9   : > { %1138 = vrot.lane.b32.xlu1 %v1097_v52, %s2450_s22  ;;  %1136 = vrot.lane.b32.xlu0 %v1096_v53, %s2450_s22  ;;  %v2144_v53 = vld [vmem:[%s3642_s2 + $0x18] sm:$0xff] }
  0xfa   : > { %1233 = vrot.lane.b32.xlu2 %v1193_v55, %s2451_s29  ;;  %v1075_v55 = vmul.f32 %v2725_v10, %v2671_v44  ;;  %939 = vmatpush.bf16.msra.mxu0 %v2144_v53  ;;  %v1173_v53 = vadd.f32 %v2885_v37, %v1076_v59 }
  0xfc   : > { %v2930_v13 = vpop.permute.xlu0 %346  ;;  %v651_v35 = vpop.permute.xlu1 %650  ;;  %v1172_v45 = vadd.f32 %v2822_v39, %v1075_v55  ;;  %v3002_v39 = vadd.f32 %v2840_v58, %v1173_v53  ;;  %v716_v58 = vmul.f32 %v2616_v25, %v2897_v41 }
  0xfe   : > { %v3005_v37 = vadd.f32 %v2918_v60, %v1172_v45 }
 0x101   : > { %1544 = vrot.lane.b32.xlu1 %v1504_v5, %s2450_s22  ;;  %1235 = vrot.lane.b32.xlu0 %v1194_v7, %s2451_s29  ;;  %v1483_v5 = vmul.f32 %v2743_v30, %v2671_v44  ;;  %v1484_v7 = vmul.f32 %v2743_v30, %v2678_v46 }
 0x102   : > { %1546 = vrot.lane.b32.xlu2 %v1505_v14, %s2450_s22 }
 0x103   : > { %v1581_v1 = vadd.f32 %v1539_v18, %v1484_v7  ;;  %v597_v18 = vmul.f32 %v2757_v43, %v2671_v44 }
 0x104   : > { %v1634_v32 = vpop.permute.xlu0 %1633 }
 0x109   : > { %354 = vrot.lane.b32.xlu1 %v313_v38, %s2450_s22  ;;  %352 = vrot.lane.b32.xlu0 %v312_v22, %s2450_s22  ;;  %v410_v38 = vmul.f32 %v2605_v21, %v2897_v41  ;;  %v409_v22 = vmul.f32 %v2605_v21, %v2900_v42 }
 0x10a   : > { %658 = vrot.lane.b32.xlu2 %v618_v23, %s2450_s22  ;;  %v1636_v23 = vpop.permute.xlu1 %1635 }
 0x10c   : > { %v444_v52 = vpop.permute.xlu0 %443 }
 0x111   : > { %1641 = vrot.lane.b32.xlu1 %v1601_v40, %s2451_s29  ;;  %660 = vrot.lane.b32.xlu0 %v619_v9, %s2450_s22  ;;  %v715_v9 = vmul.f32 %v2616_v25, %v2900_v42 }
 0x112   : > { %1643 = vrot.lane.b32.xlu2 %v1602_v28, %s2451_s29  ;;  %v2143_v28 = vld [vmem:[%s3642_s2 + $0x10] sm:$0xff] }
 0x113   : > { %v2213_v2 = vpop.permute.xlu2 %2212  ;;  %940 = vmatpush.bf16.msra.mxu0 %v2143_v28 }
 0x114   : > { %v2215_v14 = vunpack.i.h.bf16 %v2213_v2  ;;  %v2214_v15 = vunpack.i.l.bf16 %v2213_v2  ;;  %v1580_v2 = vadd.f32 %v2905_v47, %v1483_v5  ;;  %v292_v47 = vmul.f32 %v2745_v31, %v2678_v46 }
 0x115   : > { %v3013_v5 = vadd.f32 %v1636_v23, %v1581_v1  ;;  %v748_v23 = vpop.permute.xlu1 %747 }
 0x116   : > { %v562_v34 = vmax.f32 %v2759_v48, %v2215_v14  ;;  %v561_v40 = vmax.f32 %v2763_v50, %v2214_v15  ;;  %v291_v48 = vmul.f32 %v2745_v31, %v2671_v44  ;;  %v598_v50 = vmul.f32 %v2757_v43, %v2678_v46 }
 0x117   : > { %v3011_v59 = vadd.f32 %v1634_v32, %v1580_v2  ;;  %v2241_v44 = vpack.i.bf16 %v3002_v39, %v3005_v37  ;;  %v389_v32 = vadd.f32 %v2930_v13, %v292_v47  ;;  %v3043_v13 = vld [vmem:[%s2546_s21 + $0x50] sm:$0xff] }
 0x118   : > { %v577_v20 = vpack.c.bf16 %v562_v34, %v561_v40  ;;  %v388_v60 = vadd.f32 %v2879_v33, %v291_v48  ;;  %v695_v1 = vadd.f32 %v2911_v54, %v598_v50  ;;  %v1098_v40 = vmul.f32 %v2563_v6, %v3043_v13 }
 0x119   : > { %451 = vrot.lane.b32.xlu1 %v410_v38, %s2451_s29  ;;  %449 = vrot.lane.b32.xlu0 %v409_v22, %s2451_s29  ;;  %v694_v38 = vadd.f32 %v651_v35, %v597_v18  ;;  %v2246_v22 = vpack.i.bf16 %v3013_v5, %v3011_v59  ;;  %v3038_v33 = vadd.f32 %v444_v52, %v389_v32 }
 0x11a   : > { %755 = vrot.lane.b32.xlu2 %v715_v9, %s2451_s29  ;;  %2084 = vmatmul.msk.bf16.vlgmr.msra.gmra.mxu1 %vm908_vm0, %v577_v20  ;;  %v1195_v2 = vmul.f32 %v2570_v8, %v3043_v13 }
 0x11b   : > { %v2203_v55 = vpop.permute.xlu0 %2202  ;;  %v3040_v54 = vadd.f32 %v748_v23, %v694_v38 }
 0x11c   : > { %v2205_v7 = vunpack.i.h.bf16 %v2203_v55  ;;  %v2204_v14 = vunpack.i.l.bf16 %v2203_v55  ;;  %v3015_v20 = vpop.permute.xlu2 %1134 }
 0x11e   : > { %v1346_v15 = vmax.f32 %v2736_v26, %v2205_v7  ;;  %v1345_v46 = vmax.f32 %v2734_v24, %v2204_v14  ;;  %v3033_v24 = vadd.f32 %v2937_v11, %v388_v60  ;;  %v3036_v26 = vadd.f32 %v2950_v29, %v695_v1  ;;  %v3057_v29 = vld [vmem:[%s2546_s21 + $0x58] sm:$0xff] }
 0x11f   : > { %v1099_v48 = vmul.f32 %v2563_v6, %v3057_v29  ;;  %v1196_v18 = vmul.f32 %v2570_v8, %v3057_v29  ;;  %v314_v1 = vmul.f32 %v2548_v0, %v3043_v13 }
 0x120   : > { %v1361_v34 = vpack.c.bf16 %v1346_v15, %v1345_v46  ;;  %v2251_v9 = vpack.i.bf16 %v3038_v33, %v3033_v24  ;;  %v2256_v11 = vpack.i.bf16 %v3036_v26, %v3040_v54 }
 0x121   : > { %757 = vrot.lane.b32.xlu0 %v716_v58, %s2451_s29  ;;  %2242 = vrot.lane.b32.xlu1 %v2241_v44, %s2450_s22 }
 0x122   : > { %2247 = vrot.lane.b32.xlu2 %v2246_v22, %s2450_s22  ;;  %2107 = vmatmul.msk.bf16.vlgmr.msra.gmra.mxu2 %vm908_vm0, %v1361_v34  ;;  %v621_v34 = vmul.f32 %v2592_v16, %v3057_v29 }
 0x124   : > { %v3045_v35 = vpop.permute.xlu2 %1540 }
 0x129   : > { %2257 = vrot.lane.b32.xlu1 %v2256_v11, %s2450_s22  ;;  %2252 = vrot.lane.b32.xlu0 %v2251_v9, %s2450_s22 }
 0x12a   : > { %1140 = vrot.lane.b32.xlu2 %v1098_v40, %s2450_s22 }
 0x12b   : > { %v2208_v52 = vpop.permute.xlu1 %2207 }
 0x12c   : > { %v2210_v28 = vunpack.i.h.bf16 %v2208_v52  ;;  %v2209_v45 = vunpack.i.l.bf16 %v2208_v52  ;;  %v3059_v53 = vpop.permute.xlu2 %350 }
 0x12e   : > { %v1754_v50 = vmax.f32 %v2765_v51, %v2210_v28  ;;  %v1753_v47 = vmax.f32 %v2761_v49, %v2209_v45  ;;  %v1507_v49 = vmul.f32 %v2581_v12, %v3057_v29  ;;  %v1506_v51 = vmul.f32 %v2581_v12, %v3043_v13 }
 0x12f   : > { %v1604_v45 = vmul.f32 %v2594_v17, %v3057_v29 }
 0x130   : > { %v1769_v55 = vpack.c.bf16 %v1754_v50, %v1753_v47 }
 0x131   : > { %1237 = vrot.lane.b32.xlu1 %v1195_v2, %s2451_s29  ;;  %1142 = vrot.lane.b32.xlu0 %v1099_v48, %s2450_s22  ;;  %v1603_v2 = vmul.f32 %v2594_v17, %v3043_v13  ;;  %v411_v48 = vmul.f32 %v2605_v21, %v3043_v13 }
 0x132   : > { %1239 = vrot.lane.b32.xlu2 %v1196_v18, %s2451_s29  ;;  %2130 = vmatmul.msk.bf16.vlgmr.msra.gmra.mxu3 %vm908_vm0, %v1769_v55  ;;  %v1078_v55 = vmul.f32 %v2725_v10, %v2783_v3 }
 0x133   : > { %v1133_v7 = vpop.permute.xlu1 %1132  ;;  %v2218_v14 = vpop.permute.xlu0 %2217 }
 0x134   : > { %v2220_v58 = vunpack.i.h.bf16 %v2218_v14  ;;  %v2219_v60 = vunpack.i.l.bf16 %v2218_v14  ;;  %v3073_v15 = vpop.permute.xlu2 %1637 }
 0x136   : > { %v868_v46 = vmax.f32 %v2785_v61, %v2220_v58  ;;  %v867_v44 = vmax.f32 %v2787_v63, %v2219_v60  ;;  %v620_v61 = vmul.f32 %v2592_v16, %v3043_v13  ;;  %v315_v63 = vmul.f32 %v2548_v0, %v3057_v29 }
 0x137   : > { %v1485_v60 = vmul.f32 %v2743_v30, %v2780_v57 }
 0x138   : > { %v883_v32 = vpack.c.bf16 %v868_v46, %v867_v44  ;;  %v717_v44 = vmul.f32 %v2616_v25, %v3043_v13 }
 0x139   : > { %1550 = vrot.lane.b32.xlu1 %v1507_v49, %s2450_s22  ;;  %1548 = vrot.lane.b32.xlu0 %v1506_v51, %s2450_s22 }
 0x13a   : > { %356 = vrot.lane.b32.xlu2 %v314_v1, %s2450_s22  ;;  %2068 = vmatmul.msk.bf16.vlgmr.msra.gmra.mxu0 %vm908_vm0, %v883_v32  ;;  %v412_v1 = vmul.f32 %v2605_v21, %v3057_v29  ;;  %v293_v32 = vmul.f32 %v2745_v31, %v2780_v57 }
 0x13b   : > { %v1232_v38 = vpop.permute.xlu1 %1231  ;;  %v1230_v22 = vpop.permute.xlu0 %1229 }
 0x13c   : > { %v448_v23 = vpop.permute.xlu2 %447 }
 0x141   : > { %662 = vrot.lane.b32.xlu1 %v620_v61, %s2450_s22  ;;  %358 = vrot.lane.b32.xlu0 %v315_v63, %s2450_s22  ;;  %v1486_v61 = vmul.f32 %v2743_v30, %v2783_v3  ;;  %v718_v63 = vmul.f32 %v2616_v25, %v3057_v29 }
 0x142   : > { %664 = vrot.lane.b32.xlu2 %v621_v34, %s2450_s22  ;;  %v1175_v34 = vadd.f32 %v3015_v20, %v1078_v55 }
 0x143   : > { %v349_v40 = vpop.permute.xlu1 %348  ;;  %v1543_v9 = vpop.permute.xlu0 %1542 }
 0x144   : > { %v2223_v11 = vpop.permute.xlu2 %2222 }
 0x145   : > { %v2225_v52 = vunpack.i.h.bf16 %v2223_v11  ;;  %v2224_v28 = vunpack.i.l.bf16 %v2223_v11 }
 0x147   : > { %v1348_v50 = vmax.f32 %v2852_v4, %v2225_v52  ;;  %v1347_v47 = vmax.f32 %v2849_v27, %v2224_v28  ;;  %v294_v27 = vmul.f32 %v2745_v31, %v2783_v3  ;;  %v1077_v4 = vmul.f32 %v2725_v10, %v2780_v57 }
 0x148   : > { %v1582_v28 = vadd.f32 %v3045_v35, %v1485_v60 }
 0x149   : > { %1647 = vrot.lane.b32.xlu1 %v1604_v45, %s2451_s29  ;;  %1645 = vrot.lane.b32.xlu0 %v1603_v2, %s2451_s29  ;;  %v1362_v18 = vpack.c.bf16 %v1348_v50, %v1347_v47  ;;  %v391_v45 = vadd.f32 %v3059_v53, %v294_v27  ;;  %v1174_v2 = vadd.f32 %v1133_v7, %v1077_v4 }
 0x14a   : > { %453 = vrot.lane.b32.xlu2 %v411_v48, %s2451_s29  ;;  %v390_v50 = vadd.f32 %v349_v40, %v293_v32  ;;  %v1583_v47 = vadd.f32 %v1543_v9, %v1486_v61  ;;  %v3140_v35 = vadd.f32 %v3073_v15, %v1582_v28 }
 0x14b   : > { %2108 = vmatmul.msk.bf16.gmra.mxu2 %vm908_vm0, %v1362_v18  ;;  %v657_v14 = vpop.permute.xlu1 %656  ;;  %v655_v58 = vpop.permute.xlu0 %654  ;;  %v3134_v18 = vadd.f32 %v1232_v38, %v1175_v34  ;;  %v3136_v20 = vadd.f32 %v1230_v22, %v1174_v2  ;;  %v3142_v53 = vadd.f32 %v448_v23, %v391_v45  ;;  %v600_v38 = vmul.f32 %v2757_v43, %v2783_v3  ;;  %v3164_v3 = vld [vmem:[%s2546_s21 + $0x60] sm:$0xff] }
 0x14c   : > { %v2238_v49 = vpop.permute.xlu2 %2237  ;;  %v599_v22 = vmul.f32 %v2757_v43, %v2780_v57  ;;  %v1197_v45 = vmul.f32 %v2570_v8, %v3164_v3 }
 0x14d   : > { %v2240_v51 = vunpack.i.h.bf16 %v2238_v49  ;;  %v2239_v46 = vunpack.i.l.bf16 %v2238_v49  ;;  %v2261_v23 = vpack.i.bf16 %v3134_v18, %v3136_v20  ;;  %v697_v60 = vadd.f32 %v657_v14, %v600_v38  ;;  %v3167_v49 = vld [vmem:[%s2546_s21 + $0x68] sm:$0xff] }
 0x14e   : > { %v696_v27 = vadd.f32 %v655_v58, %v599_v22  ;;  %v1101_v58 = vmul.f32 %v2563_v6, %v3167_v49  ;;  %v1198_v2 = vmul.f32 %v2570_v8, %v3167_v49  ;;  %v3654_v38 = vld [vmem:[#allocation9_spill] sm:$0xff] }
 0x14f   : > { %v870_v11 = vmax.f32 %v2881_v62, %v2240_v51  ;;  %v869_v52 = vmax.f32 %v2883_v36, %v2239_v46 }
 0x151   : > { %759 = vrot.lane.b32.xlu1 %v717_v44, %s2451_s29  ;;  %455 = vrot.lane.b32.xlu0 %v412_v1, %s2451_s29  ;;  %v884_v48 = vpack.c.bf16 %v870_v11, %v869_v52  ;;  %v1100_v1 = vmul.f32 %v2563_v6, %v3164_v3 }
 0x152   : > { %761 = vrot.lane.b32.xlu2 %v718_v63, %s2451_s29 }
 0x153   : > { %2069 = vmatmul.msk.bf16.gmra.mxu0 %vm908_vm0, %v884_v48  ;;  %v446_v62 = vpop.permute.xlu1 %445  ;;  %v1640_v36 = vpop.permute.xlu0 %1639  ;;  %v1508_v48 = vmul.f32 %v2581_v12, %v3164_v3 }
 0x154   : > { %v3144_v7 = vadd.f32 %v446_v62, %v390_v50  ;;  %v3146_v40 = vadd.f32 %v1640_v36, %v1583_v47  ;;  %v3148_v9 = vpop.permute.xlu2 %1233  ;;  %v3653_v62 = vld [vmem:[#allocation10_spill] sm:$0xff] }
 0x156   : > { %v2271_v55 = vpack.i.bf16 %v3142_v53, %v3144_v7  ;;  %v2266_v15 = vpack.i.bf16 %v3146_v40, %v3140_v35 }
 0x159   : > { %2262 = vrot.lane.b32.xlu0 %v2261_v23, %s2450_s22  ;;  %2267 = vrot.lane.b32.xlu1 %v2266_v15, %s2450_s22 }
 0x15a   : > { %2272 = vrot.lane.b32.xlu2 %v2271_v55, %s2450_s22 }
 0x15b   : > { %v754_v57 = vpop.permute.xlu1 %753  ;;  %v752_v4 = vpop.permute.xlu0 %751 }
 0x15c   : > { %v3169_v51 = vadd.f32 %v754_v57, %v697_v60  ;;  %v3171_v46 = vadd.f32 %v752_v4, %v696_v27  ;;  %v3173_v44 = vpop.permute.xlu2 %1546  ;;  %v316_v27 = vmul.f32 %v2548_v0, %v3164_v3  ;;  %v317_v57 = vmul.f32 %v2548_v0, %v3167_v49 }
 0x15e   : > { %v2276_v14 = vpack.i.bf16 %v3169_v51, %v3171_v46 }
 0x161   : > { %2277 = vrot.lane.b32.xlu0 %v2276_v14, %s2450_s22  ;;  %1144 = vrot.lane.b32.xlu1 %v1100_v1, %s2450_s22 }
 0x162   : > { %1146 = vrot.lane.b32.xlu2 %v1101_v58, %s2450_s22  ;;  %v622_v58 = vmul.f32 %v2592_v16, %v3164_v3 }
 0x163   : > { %v2233_v32 = vpop.permute.xlu1 %2232  ;;  %v2228_v61 = vpop.permute.xlu0 %2227 }
 0x164   : > { %v2235_v63 = vunpack.i.h.bf16 %v2233_v32  ;;  %v2234_v34 = vunpack.i.l.bf16 %v2233_v32  ;;  %v2230_v11 = vunpack.i.h.bf16 %v2228_v61  ;;  %v2229_v52 = vunpack.i.l.bf16 %v2228_v61  ;;  %v3184_v28 = vpop.permute.xlu2 %658 }
 0x165   : > { %v623_v32 = vmul.f32 %v2592_v16, %v3167_v49  ;;  %v1605_v61 = vmul.f32 %v2594_v17, %v3164_v3 }
 0x166   : > { %v564_v50 = vmax.f32 %v2873_v56, %v2235_v63  ;;  %v563_v47 = vmax.f32 %v2875_v19, %v2234_v34  ;;  %v1756_v36 = vmax.f32 %v3653_v62, %v2230_v11  ;;  %v1755_v22 = vmax.f32 %v3654_v38, %v2229_v52 }
 0x167   : > { %v1509_v19 = vmul.f32 %v2581_v12, %v3167_v49  ;;  %v1080_v11 = vmul.f32 %v2725_v10, %v2897_v41  ;;  %v414_v62 = vmul.f32 %v2605_v21, %v3167_v49 }
 0x168   : > { %v578_v55 = vpack.c.bf16 %v564_v50, %v563_v47  ;;  %v1770_v15 = vpack.c.bf16 %v1756_v36, %v1755_v22  ;;  %v413_v50 = vmul.f32 %v2605_v21, %v3164_v3  ;;  %v1079_v47 = vmul.f32 %v2725_v10, %v2900_v42 }
 0x169   : > { %1241 = vrot.lane.b32.xlu0 %v1197_v45, %s2451_s29  ;;  %1243 = vrot.lane.b32.xlu1 %v1198_v2, %s2451_s29 }
 0x16a   : > { %1552 = vrot.lane.b32.xlu2 %v1508_v48, %s2450_s22  ;;  %2085 = vmatmul.msk.bf16.gmra.mxu1 %vm908_vm0, %v578_v55  ;;  %v1606_v48 = vmul.f32 %v2594_v17, %v3167_v49 }
 0x16b   : > { %2131 = vmatmul.msk.bf16.gmra.mxu3 %vm908_vm0, %v1770_v15  ;;  %v1139_v23 = vpop.permute.xlu1 %1138  ;;  %v1137_v56 = vpop.permute.xlu0 %1136 }
 0x16c   : > { %v1644_v60 = vpop.permute.xlu2 %1643  ;;  %v1177_v22 = vadd.f32 %v1139_v23, %v1080_v11  ;;  %v1176_v15 = vadd.f32 %v1137_v56, %v1079_v47  ;;  %v719_v23 = vmul.f32 %v2616_v25, %v3164_v3  ;;  %v720_v56 = vmul.f32 %v2616_v25, %v3167_v49 }
 0x171   : > { %1554 = vrot.lane.b32.xlu0 %v1509_v19, %s2450_s22  ;;  %360 = vrot.lane.b32.xlu1 %v316_v27, %s2450_s22 }
 0x172   : > { %362 = vrot.lane.b32.xlu2 %v317_v57, %s2450_s22 }
 0x173   : > { %v1545_v4 = vpop.permute.xlu1 %1544  ;;  %v1236_v1 = vpop.permute.xlu0 %1235 }
 0x174   : > { %v3210_v14 = vpop.permute.xlu2 %755  ;;  %v3237_v57 = vadd.f32 %v1236_v1, %v1177_v22  ;;  %v296_v1 = vmul.f32 %v2745_v31, %v2897_v41 }
 0x179   : > { %666 = vrot.lane.b32.xlu0 %v622_v58, %s2450_s22  ;;  %668 = vrot.lane.b32.xlu1 %v623_v32, %s2450_s22  ;;  %v3250_v32 = vadd.f32 %v3148_v9, %v1176_v15  ;;  %v3284_v15 = vld [vmem:[%s2546_s21 + $0x78] sm:$0xff] }
 0x17a   : > { %1649 = vrot.lane.b32.xlu2 %v1605_v61, %s2451_s29  ;;  %v295_v61 = vmul.f32 %v2745_v31, %v2900_v42 }
 0x17b   : > { %v355_v63 = vpop.permute.xlu1 %354  ;;  %v353_v34 = vpop.permute.xlu0 %352  ;;  %v2281_v11 = vpack.i.bf16 %v3237_v57, %v3250_v32 }
 0x17c   : > { %v2248_v52 = vpop.permute.xlu2 %2247 }
 0x17d   : > { %v2250_v45 = vunpack.i.h.bf16 %v2248_v52  ;;  %v2249_v2 = vunpack.i.l.bf16 %v2248_v52 }
 0x17f   : > { %v1758_v36 = vmax.f32 %v3013_v5, %v2250_v45  ;;  %v1757_v38 = vmax.f32 %v3011_v59, %v2249_v2  ;;  %v1488_v59 = vmul.f32 %v2743_v30, %v2897_v41  ;;  %v1487_v5 = vmul.f32 %v2743_v30, %v2900_v42 }
 0x180   : > { %v393_v2 = vadd.f32 %v355_v63, %v296_v1  ;;  %v602_v63 = vmul.f32 %v2757_v43, %v2897_v41 }
 0x181   : > { %1651 = vrot.lane.b32.xlu0 %v1606_v48, %s2451_s29  ;;  %457 = vrot.lane.b32.xlu1 %v413_v50, %s2451_s29  ;;  %v1771_v55 = vpack.c.bf16 %v1758_v36, %v1757_v38  ;;  %v1585_v52 = vadd.f32 %v3173_v44, %v1488_v59  ;;  %v1584_v45 = vadd.f32 %v1545_v4, %v1487_v5 }
 0x182   : > { %459 = vrot.lane.b32.xlu2 %v414_v62, %s2451_s29  ;;  %v392_v48 = vadd.f32 %v353_v34, %v295_v61  ;;  %v601_v62 = vmul.f32 %v2757_v43, %v2900_v42 }
 0x183   : > { %2132 = vmatmul.msk.bf16.gmra.mxu3 %vm908_vm0, %v1771_v55  ;;  %v1642_v19 = vpop.permute.xlu1 %1641  ;;  %v661_v27 = vpop.permute.xlu0 %660  ;;  %v3272_v38 = vadd.f32 %v1644_v60, %v1585_v52  ;;  %v3287_v60 = vld [vmem:[%s2546_s21 + $0x70] sm:$0xff]  ;;  %s2401_s21 = scalar_lea.hbm %s3646_s6, 2 }
 0x184   : > { %v3239_v58 = vpop.permute.xlu2 %1140  ;;  %v3262_v9 = vadd.f32 %v1642_v19, %v1584_v45  ;;  %v698_v55 = vadd.f32 %v3184_v28, %v601_v62  ;;  %v699_v42 = vadd.f32 %v661_v27, %v602_v63  ;;  %v1103_v28 = vmul.f32 %v2563_v6, %v3284_v15  ;;  %p2403_p4 = scmp.lt.s32.totalorder %s2401_s21, %s2397_s17 }
 0x185   : > { %v1102_v27 = vmul.f32 %v2563_v6, %v3287_v60  ;;  %v1199_v6 = vmul.f32 %v2570_v8, %v3287_v60  ;;  %v1510_v62 = vmul.f32 %v2581_v12, %v3287_v60  ;;  %v1200_v63 = vmul.f32 %v2570_v8, %v3284_v15 }
 0x186   : > { %v2286_v22 = vpack.i.bf16 %v3272_v38, %v3262_v9  ;;  %v3290_v41 = vadd.f32 %v3210_v14, %v698_v55  ;;  %p2404_p7 = por %p2403_p4, %p2402_p3 }
 0x188   : > { %p2405_p8 = pnand %p2404_p7, %p2400_p2 }
 0x189   : > { %763 = vrot.lane.b32.xlu0 %v719_v23, %s2451_s29  ;;  %765 = vrot.lane.b32.xlu1 %v720_v56, %s2451_s29 }
 0x18a   : > { %2282 = vrot.lane.b32.xlu2 %v2281_v11, %s2450_s22 }
 0x18b   : > { %v452_v50 = vpop.permute.xlu1 %451  ;;  %v450_v47 = vpop.permute.xlu0 %449 }
 0x18c   : > { %v3266_v36 = vadd.f32 %v452_v50, %v393_v2  ;;  %v3268_v44 = vadd.f32 %v450_v47, %v392_v48  ;;  %v3270_v4 = vpop.permute.xlu2 %1239 }
 0x18e   : > { %v2291_v34 = vpack.i.bf16 %v3266_v36, %v3268_v44 }
 0x191   : > { %2292 = vrot.lane.b32.xlu1 %v2291_v34, %s2450_s22  ;;  %2287 = vrot.lane.b32.xlu0 %v2286_v22, %s2450_s22 }
 0x193   : > { %v2243_v19 = vpop.permute.xlu1 %2242  ;;  %v758_v59 = vpop.permute.xlu0 %757 }
 0x194   : > { %v2245_v5 = vunpack.i.h.bf16 %v2243_v19  ;;  %v2244_v23 = vunpack.i.l.bf16 %v2243_v19  ;;  %v3292_v56 = vadd.f32 %v758_v59, %v699_v42  ;;  %v3294_v1 = vpop.permute.xlu2 %356 }
 0x196   : > { %v1350_v61 = vmax.f32 %v3002_v39, %v2245_v5  ;;  %v1349_v11 = vmax.f32 %v3005_v37, %v2244_v23  ;;  %v2296_v14 = vpack.i.bf16 %v3292_v56, %v3290_v41 }
 0x198   : > { %2297 = vrot.lane.b32.xlu2 %v2296_v14, %s2450_s22  ;;  %v1363_v52 = vpack.c.bf16 %v1350_v61, %v1349_v11  ;;  %v624_v61 = vmul.f32 %v2592_v16, %v3287_v60  ;;  %v625_v11 = vmul.f32 %v2592_v16, %v3284_v15  ;;  %v1082_v14 = vmul.f32 %v2725_v10, %v3057_v29 }
 0x199   : > { %1150 = vrot.lane.b32.xlu1 %v1103_v28, %s2450_s22  ;;  %1148 = vrot.lane.b32.xlu0 %v1102_v27, %s2450_s22 }
 0x19a   : > { %2109 = vmatmul.msk.bf16.gmra.mxu2 %vm908_vm0, %v1363_v52 }
 0x19b   : > { %v2258_v45 = vpop.permute.xlu1 %2257  ;;  %v2253_v2 = vpop.permute.xlu0 %2252 }
 0x19c   : > { %v2260_v39 = vunpack.i.h.bf16 %v2258_v45  ;;  %v2259_v48 = vunpack.i.l.bf16 %v2258_v45  ;;  %v2255_v37 = vunpack.i.h.bf16 %v2253_v2  ;;  %v2254_v50 = vunpack.i.l.bf16 %v2253_v2  ;;  %v3310_v47 = vpop.permute.xlu2 %664 }
 0x19e   : > { %v872_v34 = vmax.f32 %v3036_v26, %v2260_v39  ;;  %v871_v22 = vmax.f32 %v3040_v54, %v2259_v48  ;;  %v566_v55 = vmax.f32 %v3038_v33, %v2255_v37  ;;  %v565_v42 = vmax.f32 %v3033_v24, %v2254_v50  ;;  %v1027_v39 = vpop.f32.mrf.mxu1 }
 0x19f   : > { %v1511_v33 = vmul.f32 %v2581_v12, %v3284_v15  ;;  %v319_v24 = vmul.f32 %v2548_v0, %v3284_v15  ;;  %v318_v54 = vmul.f32 %v2548_v0, %v3287_v60  ;;  %v1607_v12 = vmul.f32 %v2594_v17, %v3287_v60 }
 0x1a0   : > { %1245 = vrot.lane.b32.xlu2 %v1199_v6, %s2451_s29  ;;  %v885_v19 = vpack.c.bf16 %v872_v34, %v871_v22  ;;  %v579_v59 = vpack.c.bf16 %v566_v55, %v565_v42  ;;  %v1081_v0 = vmul.f32 %v2725_v10, %v3043_v13  ;;  %v1608_v6 = vmul.f32 %v2594_v17, %v3284_v15 }
 0x1a1   : > { %1556 = vrot.lane.b32.xlu1 %v1510_v62, %s2450_s22  ;;  %1247 = vrot.lane.b32.xlu0 %v1200_v63, %s2451_s29  ;;  %v416_v37 = vmul.f32 %v2605_v21, %v3284_v15  ;;  %v415_v50 = vmul.f32 %v2605_v21, %v3287_v60  ;;  %v1490_v21 = vmul.f32 %v2743_v30, %v3057_v29 }
 0x1a2   : > { %2070 = vmatmul.msk.bf16.gmra.mxu0 %vm908_vm0, %v885_v19  ;;  %2086 = vmatmul.msk.bf16.gmra.mxu1 %vm908_vm0, %v579_v59  ;;  %v1178_v62 = vadd.f32 %v3239_v58, %v1081_v0 }
 0x1a3   : > { %v1238_v8 = vpop.permute.xlu1 %1237  ;;  %v1143_v26 = vpop.permute.xlu0 %1142 }
 0x1a4   : > { %v3325_v5 = vpop.permute.xlu2 %453  ;;  %v1179_v63 = vadd.f32 %v1143_v26, %v1082_v14  ;;  %v297_v26 = vmul.f32 %v2745_v31, %v3043_v13 }
 0x1a5   : > { %v1419_v34 = vpop.f32.mrf.mxu2 }
 0x1a8   : > { %1558 = vrot.lane.b32.xlu2 %v1511_v33, %s2450_s22  ;;  %v3372_v33 = vadd.f32 %v3270_v4, %v1179_v63  ;;  %v722_v4 = vmul.f32 %v2616_v25, %v3284_v15 }
 0x1a9   : > { %366 = vrot.lane.b32.xlu1 %v319_v24, %s2450_s22  ;;  %364 = vrot.lane.b32.xlu0 %v318_v54, %s2450_s22 }
 0x1ab   : > { %v1551_v23 = vpop.permute.xlu1 %1550  ;;  %v1549_v28 = vpop.permute.xlu0 %1548 }
 0x1ac   : > { %v3336_v27 = vpop.permute.xlu2 %761  ;;  %v1587_v14 = vadd.f32 %v1551_v23, %v1490_v21 }
 0x1b0   : > { %670 = vrot.lane.b32.xlu2 %v624_v61, %s2450_s22  ;;  %v1489_v61 = vmul.f32 %v2743_v30, %v3043_v13 }
 0x1b1   : > { %1653 = vrot.lane.b32.xlu1 %v1607_v12, %s2451_s29  ;;  %672 = vrot.lane.b32.xlu0 %v625_v11, %s2450_s22  ;;  %v603_v12 = vmul.f32 %v2757_v43, %v3043_v13 }
 0x1b3   : > { %v663_v52 = vpop.permute.xlu1 %662  ;;  %v359_v45 = vpop.permute.xlu0 %358 }
 0x1b4   : > { %v2273_v2 = vpop.permute.xlu2 %2272 }
 0x1b5   : > { %v2275_v16 = vunpack.i.h.bf16 %v2273_v2  ;;  %v2274_v48 = vunpack.i.l.bf16 %v2273_v2  ;;  %v1827_v19 = vpop.f32.mrf.mxu3  ;;  %v298_v2 = vmul.f32 %v2745_v31, %v3057_v29 }
 0x1b7   : > { %v568_v22 = vmax.f32 %v3142_v53, %v2275_v16  ;;  %v567_v55 = vmax.f32 %v3144_v7, %v2274_v48  ;;  %v942_v42 = vpop.f32.mrf.mxu0  ;;  %v604_v53 = vmul.f32 %v2757_v43, %v3057_v29  ;;  %v3369_v7 = vadd.f32 %v1238_v8, %v1178_v62  ;;  %v1029_v16 = vpop.f32.mrf.mxu1 }
 0x1b8   : > { %v1028_v17 = vadd.f32 %v1027_v39, %v942_v42  ;;  %1655 = vrot.lane.b32.xlu2 %v1608_v6, %s2451_s29  ;;  %v721_v8 = vmul.f32 %v2616_v25, %v3287_v60  ;;  %v394_v6 = vadd.f32 %v3294_v1, %v297_v26  ;;  %v3395_v25 = vld [vmem:[%s3643_s3] ss:$0 sm:$0xff]  ;;  %v1421_v29 = vpop.f32.mrf.mxu2  ;;  %v395_v1 = vadd.f32 %v359_v45, %v298_v2 }
 0x1b9   : > { %463 = vrot.lane.b32.xlu1 %v416_v37, %s2451_s29  ;;  %461 = vrot.lane.b32.xlu0 %v415_v50, %s2451_s29  ;;  %v580_v59 = vpack.c.bf16 %v568_v22, %v567_v55  ;;  %v701_v39 = vadd.f32 %v3310_v47, %v604_v53  ;;  %v2301_v13 = vpack.i.bf16 %v3372_v33, %v3369_v7 }
 0x1ba   : > { %v1459_v58 = vadd.f32 %v1419_v34, %v1028_v17  ;;  %v1586_v37 = vadd.f32 %v1549_v28, %v1489_v61  ;;  %v700_v50 = vadd.f32 %v663_v52, %v603_v12  ;;  %v3404_v63 = vadd.f32 %v3325_v5, %v394_v6 }
 0x1bb   : > { %2087 = vmatmul.msk.bf16.gmra.mxu1 %vm908_vm0, %v580_v59  ;;  %v1648_v24 = vpop.permute.xlu1 %1647  ;;  %v1646_v54 = vpop.permute.xlu0 %1645  ;;  %v3407_v34 = vadd.f32 %v3336_v27, %v701_v39 }
 0x1bc   : > { %v1867_v11 = vadd.f32 %v1827_v19, %v1459_v58  ;;  %v3379_v0 = vpop.permute.xlu2 %1146  ;;  %v3399_v47 = vadd.f32 %v1648_v24, %v1587_v14  ;;  %v3401_v23 = vadd.f32 %v1646_v54, %v1586_v37 }
 0x1bd   : > { %v1829_v28 = vpop.f32.mrf.mxu3 }
 0x1be   : > { %v1887_v59 = vadd.f32 %v3395_v25, %v1867_v11  ;;  %v2306_v21 = vpack.i.bf16 %v3399_v47, %v3401_v23 }
 0x1bf   : > { %v944_v48 = vpop.f32.mrf.mxu0 }
 0x1c0   : > { %v1030_v62 = vadd.f32 %v1029_v16, %v944_v48  ;;  %767 = vrot.lane.b32.xlu2 %v721_v8, %s2451_s29  ;;  %v1903_v26 = vmax.f32 %v1887_v59, 0.0 }
 0x1c1   : > { %769 = vrot.lane.b32.xlu0 %v722_v4, %s2451_s29  ;;  %2302 = vrot.lane.b32.xlu1 %v2301_v13, %s2450_s22 }
 0x1c2   : > { %v1460_v52 = vadd.f32 %v1421_v29, %v1030_v62  ;;  %v1084_v62 = vmul.f32 %v2725_v10, %v3167_v49 }
 0x1c3   : > { %v760_v22 = vpop.permute.xlu1 %759  ;;  %v456_v55 = vpop.permute.xlu0 %455 }
 0x1c4   : > { %v1868_v42 = vadd.f32 %v1829_v28, %v1460_v52  ;;  %v3409_v19 = vadd.f32 %v760_v22, %v700_v50  ;;  %v3411_v17 = vadd.f32 %v456_v55, %v395_v1  ;;  %v3413_v45 = vpop.permute.xlu2 %1552  ;;  %v1181_v28 = vadd.f32 %v3379_v0, %v1084_v62 }
 0x1c6   : > { %v2316_v5 = vpack.i.bf16 %v3407_v34, %v3409_v19  ;;  %v2311_v27 = vpack.i.bf16 %v3411_v17, %v3404_v63  ;;  %v1888_v58 = vadd.f32 %v3395_v25, %v1868_v42 }
 0x1c8   : > { %2307 = vrot.lane.b32.xlu2 %v2306_v21, %s2450_s22  ;;  %v1904_v53 = vmax.f32 %v1888_v58, 0.0 }
 0x1c9   : > { %2312 = vrot.lane.b32.xlu0 %v2311_v27, %s2450_s22  ;;  %2317 = vrot.lane.b32.xlu1 %v2316_v5, %s2450_s22 }
 0x1ca   : > { %v3426_v24 = vpack.c.bf16 %v1904_v53, %v1903_v26 }
 0x1cb   : > { %v2263_v54 = vpop.permute.xlu0 %2262  ;;  %v2268_v61 = vpop.permute.xlu1 %2267 }
 0x1cc   : > { %v2265_v12 = vunpack.i.h.bf16 %v2263_v54  ;;  %v2264_v11 = vunpack.i.l.bf16 %v2263_v54  ;;  %v2270_v8 = vunpack.i.h.bf16 %v2268_v61  ;;  %v2269_v4 = vunpack.i.l.bf16 %v2268_v61  ;;  %v363_v14 = vpop.permute.xlu2 %362 }
 0x1ce   : > { %v1352_v2 = vmax.f32 %v3134_v18, %v2265_v12  ;;  %v1351_v6 = vmax.f32 %v3136_v20, %v2264_v11  ;;  %v1760_v39 = vmax.f32 %v3146_v40, %v2270_v8  ;;  %v1759_v16 = vmax.f32 %v3140_v35, %v2269_v4  ;;  %v1424_v54 = vpop.f32.mrf.mxu2 }
 0x1cf   : > { %v1083_v18 = vmul.f32 %v2725_v10, %v3164_v3 }
 0x1d0   : > { %v1364_v13 = vpack.c.bf16 %v1352_v2, %v1351_v6  ;;  %v1772_v48 = vpack.c.bf16 %v1760_v39, %v1759_v16  ;;  %v947_v0 = vpop.f32.mrf.mxu0  ;;  %v1491_v16 = vmul.f32 %v2743_v30, %v3164_v3 }
 0x1d2   : > { %2110 = vmatmul.msk.bf16.gmra.mxu2 %vm908_vm0, %v1364_v13  ;;  %2133 = vmatmul.msk.bf16.gmra.mxu3 %vm908_vm0, %v1772_v48  ;;  %v300_v13 = vmul.f32 %v2745_v31, %v3167_v49  ;;  %v299_v48 = vmul.f32 %v2745_v31, %v3164_v3 }
 0x1d3   : > { %v2278_v37 = vpop.permute.xlu0 %2277  ;;  %v1145_v50 = vpop.permute.xlu1 %1144 }
 0x1d4   : > { %v2280_v29 = vunpack.i.h.bf16 %v2278_v37  ;;  %v2279_v1 = vunpack.i.l.bf16 %v2278_v37  ;;  %v1650_v20 = vpop.permute.xlu2 %1649  ;;  %v1180_v52 = vadd.f32 %v1145_v50, %v1083_v18 }
 0x1d6   : > { %v874_v40 = vmax.f32 %v3169_v51, %v2280_v29  ;;  %v873_v35 = vmax.f32 %v3171_v46, %v2279_v1  ;;  %v1588_v29 = vadd.f32 %v3413_v45, %v1491_v16  ;;  %v397_v1 = vadd.f32 %v363_v14, %v300_v13 }
 0x1d8   : > { %v886_v22 = vpack.c.bf16 %v874_v40, %v873_v35  ;;  %v949_v37 = vpop.f32.mrf.mxu0  ;;  %v1426_v35 = vpop.f32.mrf.mxu2 }
 0x1da   : > { %2071 = vmatmul.msk.bf16.gmra.mxu0 %vm908_vm0, %v886_v22 }
 0x1db   : > { %v1242_v55 = vpop.permute.xlu0 %1241  ;;  %v1244_v42 = vpop.permute.xlu1 %1243 }
 0x1dc   : > { %v3442_v59 = vadd.f32 %v1242_v55, %v1180_v52  ;;  %v3444_v21 = vadd.f32 %v1244_v42, %v1181_v28  ;;  %v460_v5 = vpop.permute.xlu2 %459  ;;  %v606_v55 = vmul.f32 %v2757_v43, %v3167_v49 }
 0x1de   : > { %v2321_v27 = vpack.i.bf16 %v3444_v21, %v3442_v59 }
 0x1e0   : > { %2322 = vrot.lane.b32.xlu2 %v2321_v27, %s2450_s22 }
 0x1e3   : > { %v1555_v51 = vpop.permute.xlu0 %1554  ;;  %v361_v46 = vpop.permute.xlu1 %360 }
 0x1e4   : > { %v2283_v58 = vpop.permute.xlu2 %2282  ;;  %v396_v18 = vadd.f32 %v361_v46, %v299_v48  ;;  %v605_v46 = vmul.f32 %v2757_v43, %v3164_v3 }
 0x1e5   : > { %v2285_v26 = vunpack.i.h.bf16 %v2283_v58  ;;  %v2284_v53 = vunpack.i.l.bf16 %v2283_v58 }
 0x1e7   : > { %v1354_v61 = vmax.f32 %v3237_v57, %v2285_v26  ;;  %v1353_v12 = vmax.f32 %v3250_v32, %v2284_v53  ;;  %v1032_v11 = vpop.f32.mrf.mxu1  ;;  %v1492_v57 = vmul.f32 %v2743_v30, %v3167_v49  ;;  %v3463_v26 = vadd.f32 %v1650_v20, %v1588_v29 }
 0x1e8   : > { %v1033_v8 = vadd.f32 %v1032_v11, %v947_v0  ;;  %v3465_v53 = vadd.f32 %v460_v5, %v397_v1 }
 0x1e9   : > { %v1365_v4 = vpack.c.bf16 %v1354_v61, %v1353_v12  ;;  %v1589_v28 = vadd.f32 %v1555_v51, %v1492_v57 }
 0x1ea   : > { %v1461_v2 = vadd.f32 %v1424_v54, %v1033_v8 }
 0x1eb   : > { %2111 = vmatmul.msk.bf16.gmra.mxu2 %vm908_vm0, %v1365_v4  ;;  %v667_v6 = vpop.permute.xlu0 %666  ;;  %v669_v39 = vpop.permute.xlu1 %668 }
 0x1ec   : > { %v703_v8 = vadd.f32 %v669_v39, %v606_v55  ;;  %v702_v3 = vadd.f32 %v667_v6, %v605_v46 }
 0x1ee   : > { %v1832_v32 = vpop.f32.mrf.mxu3 }
 0x1ef   : > { %v1869_v50 = vadd.f32 %v1832_v32, %v1461_v2  ;;  %v1034_v62 = vpop.f32.mrf.mxu1 }
 0x1f0   : > { %v1035_v40 = vadd.f32 %v1034_v62, %v949_v37 }
 0x1f1   : > { %v1889_v5 = vadd.f32 %v3395_v25, %v1869_v50 }
 0x1f2   : > { %v2298_v52 = vpop.permute.xlu2 %2297  ;;  %v1462_v22 = vadd.f32 %v1426_v35, %v1035_v40 }
 0x1f3   : > { %v2300_v42 = vunpack.i.h.bf16 %v2298_v52  ;;  %v2299_v27 = vunpack.i.l.bf16 %v2298_v52  ;;  %v1652_v58 = vpop.permute.xlu0 %1651  ;;  %v458_v0 = vpop.permute.xlu1 %457  ;;  %v1905_v4 = vmax.f32 %v1889_v5, 0.0 }
 0x1f4   : > { %v3467_v54 = vadd.f32 %v1652_v58, %v1589_v28  ;;  %v3469_v45 = vadd.f32 %v458_v0, %v396_v18  ;;  %v1086_v0 = vmul.f32 %v2725_v10, %v3284_v15 }
 0x1f5   : > { %v876_v14 = vmax.f32 %v3292_v56, %v2300_v42  ;;  %v875_v51 = vmax.f32 %v3290_v41, %v2299_v27 }
 0x1f6   : > { %v2326_v49 = vpack.i.bf16 %v3467_v54, %v3463_v26  ;;  %v2331_v20 = vpack.i.bf16 %v3465_v53, %v3469_v45  ;;  %v1834_v61 = vpop.f32.mrf.mxu3 }
 0x1f7   : > { %v1870_v12 = vadd.f32 %v1834_v61, %v1462_v22  ;;  %v887_v11 = vpack.c.bf16 %v876_v14, %v875_v51 }
 0x1f8   : > { %2327 = vrot.lane.b32.xlu0 %v2326_v49, %s2450_s22  ;;  %2332 = vrot.lane.b32.xlu1 %v2331_v20, %s2450_s22 }
 0x1f9   : > { %v1890_v41 = vadd.f32 %v3395_v25, %v1870_v12  ;;  %2072 = vmatmul.msk.bf16.gmra.mxu0 %vm908_vm0, %v887_v11  ;;  %v1493_v11 = vmul.f32 %v2743_v30, %v3287_v60 }
 0x1fa   : > { %v1246_v56 = vpop.permute.xlu2 %1245 }
 0x1fb   : > { %v1906_v2 = vmax.f32 %v1890_v41, 0.0  ;;  %v764_v16 = vpop.permute.xlu0 %763  ;;  %v766_v13 = vpop.permute.xlu1 %765 }
 0x1fc   : > { %v3484_v48 = vadd.f32 %v764_v16, %v702_v3  ;;  %v3486_v57 = vadd.f32 %v766_v13, %v703_v8 }
 0x1fd   : > { %v3488_v32 = vpack.c.bf16 %v1906_v2, %v1905_v4 }
 0x1fe   : > { %v2336_v39 = vpack.i.bf16 %v3486_v57, %v3484_v48 }
 0x200   : > { %2337 = vrot.lane.b32.xlu2 %v2336_v39, %s2450_s22 }
 0x202   : > { %v1559_v37 = vpop.permute.xlu2 %1558 }
 0x203   : > { %v2293_v50 = vpop.permute.xlu1 %2292  ;;  %v2288_v62 = vpop.permute.xlu0 %2287 }
 0x204   : > { %v2295_v6 = vunpack.i.h.bf16 %v2293_v50  ;;  %v2294_v29 = vunpack.i.l.bf16 %v2293_v50  ;;  %v2290_v1 = vunpack.i.h.bf16 %v2288_v62  ;;  %v2289_v18 = vunpack.i.l.bf16 %v2288_v62 }
 0x206   : > { %v570_v40 = vmax.f32 %v3266_v36, %v2295_v6  ;;  %v569_v35 = vmax.f32 %v3268_v44, %v2294_v29  ;;  %v1762_v28 = vmax.f32 %v3272_v38, %v2290_v1  ;;  %v1761_v52 = vmax.f32 %v3262_v9, %v2289_v18  ;;  %v1837_v4 = vpop.f32.mrf.mxu3 }
 0x207   : > { %v1085_v36 = vmul.f32 %v2725_v10, %v3287_v60  ;;  %v1494_v10 = vmul.f32 %v2743_v30, %v3284_v15  ;;  %v302_v18 = vmul.f32 %v2745_v31, %v3284_v15 }
 0x208   : > { %v581_v22 = vpack.c.bf16 %v570_v40, %v569_v35  ;;  %v1773_v55 = vpack.c.bf16 %v1762_v28, %v1761_v52  ;;  %v301_v28 = vmul.f32 %v2745_v31, %v3287_v60 }
 0x20a   : > { %v3497_v42 = vpop.permute.xlu2 %670  ;;  %2088 = vmatmul.msk.bf16.gmra.mxu1 %vm908_vm0, %v581_v22  ;;  %2134 = vmatmul.msk.bf16.gmra.mxu3 %vm908_vm0, %v1773_v55 }
 0x20b   : > { %v1151_v27 = vpop.permute.xlu1 %1150  ;;  %v1149_v58 = vpop.permute.xlu0 %1148 }
 0x20c   : > { %v1183_v44 = vadd.f32 %v1151_v27, %v1086_v0  ;;  %v1182_v38 = vadd.f32 %v1149_v58, %v1085_v36 }
 0x20e   : > { %v3505_v46 = vadd.f32 %v1246_v56, %v1182_v38  ;;  %v1591_v56 = vadd.f32 %v1559_v37, %v1494_v10  ;;  %v608_v10 = vmul.f32 %v2757_v43, %v3284_v15 }
 0x212   : > { %v1656_v14 = vpop.permute.xlu2 %1655 }
 0x213   : > { %v1557_v9 = vpop.permute.xlu1 %1556  ;;  %v1248_v51 = vpop.permute.xlu0 %1247  ;;  %v3516_v1 = vadd.f32 %v1656_v14, %v1591_v56 }
 0x214   : > { %v3507_v49 = vadd.f32 %v1248_v51, %v1183_v44  ;;  %v1590_v2 = vadd.f32 %v1557_v9, %v1493_v11  ;;  %v1839_v44 = vpop.f32.mrf.mxu3 }
 0x216   : > { %v2341_v20 = vpack.i.bf16 %v3507_v49, %v3505_v46 }
 0x218   : > { %2342 = vrot.lane.b32.xlu0 %v2341_v20, %s2450_s22 }
 0x21a   : > { %v768_v61 = vpop.permute.xlu2 %767 }
 0x21b   : > { %v367_v5 = vpop.permute.xlu1 %366  ;;  %v365_v12 = vpop.permute.xlu0 %364 }
 0x21c   : > { %v399_v58 = vadd.f32 %v367_v5, %v302_v18 }
 0x21d   : > { %v1429_v8 = vpop.f32.mrf.mxu2 }
 0x21f   : > { %v952_v41 = vpop.f32.mrf.mxu0  ;;  %v1037_v3 = vpop.f32.mrf.mxu1 }
 0x220   : > { %v1038_v16 = vadd.f32 %v1037_v3, %v952_v41 }
 0x222   : > { %v1463_v13 = vadd.f32 %v1429_v8, %v1038_v16  ;;  %v2308_v39 = vpop.permute.xlu2 %2307 }
 0x223   : > { %v2310_v50 = vunpack.i.h.bf16 %v2308_v39  ;;  %v2309_v62 = vunpack.i.l.bf16 %v2308_v39  ;;  %v1654_v6 = vpop.permute.xlu1 %1653  ;;  %v673_v29 = vpop.permute.xlu0 %672 }
 0x224   : > { %v1871_v40 = vadd.f32 %v1837_v4, %v1463_v13  ;;  %v3520_v30 = vadd.f32 %v1654_v6, %v1590_v2  ;;  %v705_v3 = vadd.f32 %v673_v29, %v608_v10 }
 0x225   : > { %v1764_v35 = vmax.f32 %v3399_v47, %v2310_v50  ;;  %v1763_v37 = vmax.f32 %v3401_v23, %v2309_v62  ;;  %v1431_v36 = vpop.f32.mrf.mxu2  ;;  %v398_v47 = vadd.f32 %v365_v12, %v301_v28  ;;  %v607_v23 = vmul.f32 %v2757_v43, %v3287_v60 }
 0x226   : > { %v2346_v52 = vpack.i.bf16 %v3516_v1, %v3520_v30  ;;  %v1891_v5 = vadd.f32 %v3395_v25, %v1871_v40 }
 0x227   : > { %v954_v22 = vpop.f32.mrf.mxu0  ;;  %v1039_v55 = vpop.f32.mrf.mxu1  ;;  %v1774_v27 = vpack.c.bf16 %v1764_v35, %v1763_v37  ;;  %v704_v8 = vadd.f32 %v3497_v42, %v607_v23 }
 0x228   : > { %v1040_v0 = vadd.f32 %v1039_v55, %v954_v22  ;;  %2347 = vrot.lane.b32.xlu1 %v2346_v52, %s2450_s22  ;;  %v1907_v60 = vmax.f32 %v1891_v5, 0.0 }
 0x229   : > { %2135 = vmatmul.msk.bf16.gmra.mxu3 %vm908_vm0, %v1774_v27  ;;  %v3546_v16 = vadd.f32 %v768_v61, %v704_v8 }
 0x22a   : > { %v1464_v38 = vadd.f32 %v1431_v36, %v1040_v0 }
 0x22b   : > { %v464_v31 = vpop.permute.xlu1 %463  ;;  %v462_v14 = vpop.permute.xlu0 %461 }
 0x22c   : > { %v1872_v9 = vadd.f32 %v1839_v44, %v1464_v38  ;;  %v3532_v51 = vadd.f32 %v464_v31, %v399_v58  ;;  %v3534_v20 = vadd.f32 %v462_v14, %v398_v47 }
 0x22e   : > { %v2351_v11 = vpack.i.bf16 %v3532_v51, %v3534_v20  ;;  %v1892_v12 = vadd.f32 %v3395_v25, %v1872_v9 }
 0x230   : > { %2352 = vrot.lane.b32.xlu2 %v2351_v11, %s2450_s22  ;;  %v1908_v41 = vmax.f32 %v1892_v12, 0.0 }
 0x232   : > { %v3544_v56 = vpack.c.bf16 %v1908_v41, %v1907_v60 }
 0x233   : > { %v770_v4 = vpop.permute.xlu0 %769  ;;  %v2303_v2 = vpop.permute.xlu1 %2302 }
 0x234   : > { %v3548_v13 = vadd.f32 %v770_v4, %v705_v3  ;;  %v2305_v43 = vunpack.i.h.bf16 %v2303_v2  ;;  %v2304_v15 = vunpack.i.l.bf16 %v2303_v2 }
 0x236   : > { %v2356_v39 = vpack.i.bf16 %v3548_v13, %v3546_v16  ;;  %v1356_v42 = vmax.f32 %v3372_v33, %v2305_v43  ;;  %v1355_v50 = vmax.f32 %v3369_v7, %v2304_v15 }
 0x238   : > { %2357 = vrot.lane.b32.xlu0 %v2356_v39, %s2450_s22  ;;  %v1366_v62 = vpack.c.bf16 %v1356_v42, %v1355_v50 }
 0x23a   : > { %2112 = vmatmul.msk.bf16.gmra.mxu2 %vm908_vm0, %v1366_v62  ;;  %v2323_v37 = vpop.permute.xlu2 %2322 }
 0x23b   : > { %v2313_v6 = vpop.permute.xlu0 %2312  ;;  %v2318_v29 = vpop.permute.xlu1 %2317  ;;  %v2325_v22 = vunpack.i.h.bf16 %v2323_v37  ;;  %v2324_v55 = vunpack.i.l.bf16 %v2323_v37 }
 0x23c   : > { %v2315_v61 = vunpack.i.h.bf16 %v2313_v6  ;;  %v2314_v18 = vunpack.i.l.bf16 %v2313_v6  ;;  %v2320_v40 = vunpack.i.h.bf16 %v2318_v29  ;;  %v2319_v35 = vunpack.i.l.bf16 %v2318_v29 }
 0x23d   : > { %v1358_v0 = vmax.f32 %v3444_v21, %v2325_v22  ;;  %v1357_v36 = vmax.f32 %v3442_v59, %v2324_v55 }
 0x23e   : > { %v572_v28 = vmax.f32 %v3411_v17, %v2315_v61  ;;  %v571_v52 = vmax.f32 %v3404_v63, %v2314_v18  ;;  %v878_v33 = vmax.f32 %v3407_v34, %v2320_v40  ;;  %v877_v7 = vmax.f32 %v3409_v19, %v2319_v35  ;;  %v1042_v63 = vpop.f32.mrf.mxu1 }
 0x23f   : > { %v1367_v44 = vpack.c.bf16 %v1358_v0, %v1357_v36 }
 0x240   : > { %v888_v27 = vpack.c.bf16 %v878_v33, %v877_v7  ;;  %v582_v58 = vpack.c.bf16 %v572_v28, %v571_v52 }
 0x242   : > { %2073 = vmatmul.msk.bf16.gmra.mxu0 %vm908_vm0, %v888_v27  ;;  %2089 = vmatmul.msk.bf16.gmra.mxu1 %vm908_vm0, %v582_v58 }
 0x246   : > { %v1044_v21 = vpop.f32.mrf.mxu1 }
 0x24a   : > { %2113 = vmatmul.msk.bf16.gmra.mxu2 %vm908_vm0, %v1367_v44 }
 0x255   : > { %v1434_v17 = vpop.f32.mrf.mxu2  ;;  %v1842_v19 = vpop.f32.mrf.mxu3 }
 0x257   : > { %v957_v34 = vpop.f32.mrf.mxu0 }
 0x258   : > { %v1043_v47 = vadd.f32 %v1042_v63, %v957_v34 }
 0x25a   : > { %v1465_v38 = vadd.f32 %v1434_v17, %v1043_v47  ;;  %v2338_v23 = vpop.permute.xlu2 %2337 }
 0x25b   : > { %v2340_v31 = vunpack.i.h.bf16 %v2338_v23  ;;  %v2339_v14 = vunpack.i.l.bf16 %v2338_v23 }
 0x25c   : > { %v1873_v9 = vadd.f32 %v1842_v19, %v1465_v38 }
 0x25d   : > { %v880_v5 = vmax.f32 %v3486_v57, %v2340_v31  ;;  %v879_v10 = vmax.f32 %v3484_v48, %v2339_v14  ;;  %v1436_v8 = vpop.f32.mrf.mxu2  ;;  %v1844_v41 = vpop.f32.mrf.mxu3 }
 0x25e   : > { %v1893_v4 = vadd.f32 %v3395_v25, %v1873_v9 }
 0x25f   : > { %v959_v11 = vpop.f32.mrf.mxu0  ;;  %v889_v59 = vpack.c.bf16 %v880_v5, %v879_v10 }
 0x260   : > { %v1045_v12 = vadd.f32 %v1044_v21, %v959_v11  ;;  %v1909_v43 = vmax.f32 %v1893_v4, 0.0 }
 0x261   : > { %2074 = vmatmul.msk.bf16.gmra.mxu0 %vm908_vm0, %v889_v59 }
 0x262   : > { %v1466_v60 = vadd.f32 %v1436_v8, %v1045_v12 }
 0x264   : > { %v1874_v3 = vadd.f32 %v1844_v41, %v1466_v60 }
 0x266   : > { %v1894_v2 = vadd.f32 %v3395_v25, %v1874_v3 }
 0x268   : > { %v1910_v15 = vmax.f32 %v1894_v2, 0.0 }
 0x26a   : > { %v2328_v39 = vpop.permute.xlu0 %2327  ;;  %v2333_v57 = vpop.permute.xlu1 %2332  ;;  %v3570_v42 = vpack.c.bf16 %v1910_v15, %v1909_v43 }
 0x26b   : > { %v2330_v48 = vunpack.i.h.bf16 %v2328_v39  ;;  %v2329_v50 = vunpack.i.l.bf16 %v2328_v39  ;;  %v2335_v62 = vunpack.i.h.bf16 %v2333_v57  ;;  %v2334_v6 = vunpack.i.l.bf16 %v2333_v57 }
 0x26d   : > { %v1766_v29 = vmax.f32 %v3467_v54, %v2330_v48  ;;  %v1765_v61 = vmax.f32 %v3463_v26, %v2329_v50  ;;  %v574_v18 = vmax.f32 %v3465_v53, %v2335_v62  ;;  %v573_v40 = vmax.f32 %v3469_v45, %v2334_v6 }
 0x26e   : > { %v1439_v52 = vpop.f32.mrf.mxu2 }
 0x26f   : > { %v583_v35 = vpack.c.bf16 %v574_v18, %v573_v40  ;;  %v1775_v37 = vpack.c.bf16 %v1766_v29, %v1765_v61 }
 0x271   : > { %2090 = vmatmul.msk.bf16.gmra.mxu1 %vm908_vm0, %v583_v35  ;;  %2136 = vmatmul.msk.bf16.gmra.mxu3 %vm908_vm0, %v1775_v37 }
 0x276   : > { %v962_v28 = vpop.f32.mrf.mxu0  ;;  %v1441_v31 = vpop.f32.mrf.mxu2 }
 0x27e   : > { %v964_v34 = vpop.f32.mrf.mxu0 }
 0x287   : > { %v1047_v33 = vpop.f32.mrf.mxu1 }
 0x288   : > { %v1048_v7 = vadd.f32 %v1047_v33, %v962_v28 }
 0x28a   : > { %v2343_v22 = vpop.permute.xlu0 %2342  ;;  %v2353_v55 = vpop.permute.xlu2 %2352  ;;  %v1467_v27 = vadd.f32 %v1439_v52, %v1048_v7 }
 0x28b   : > { %v2345_v54 = vunpack.i.h.bf16 %v2343_v22  ;;  %v2344_v58 = vunpack.i.l.bf16 %v2343_v22  ;;  %v2355_v26 = vunpack.i.h.bf16 %v2353_v55  ;;  %v2354_v0 = vunpack.i.l.bf16 %v2353_v55 }
 0x28d   : > { %v1360_v53 = vmax.f32 %v3507_v49, %v2345_v54  ;;  %v1359_v45 = vmax.f32 %v3505_v46, %v2344_v58  ;;  %v576_v36 = vmax.f32 %v3532_v51, %v2355_v26  ;;  %v575_v44 = vmax.f32 %v3534_v20, %v2354_v0  ;;  %v1847_v63 = vpop.f32.mrf.mxu3 }
 0x28e   : > { %v1875_v17 = vadd.f32 %v1847_v63, %v1467_v27 }
 0x28f   : > { %v1049_v47 = vpop.f32.mrf.mxu1  ;;  %v584_v19 = vpack.c.bf16 %v576_v36, %v575_v44  ;;  %v1368_v38 = vpack.c.bf16 %v1360_v53, %v1359_v45 }
 0x290   : > { %v1050_v23 = vadd.f32 %v1049_v47, %v964_v34  ;;  %v1895_v46 = vadd.f32 %v3395_v25, %v1875_v17 }
 0x291   : > { %2091 = vmatmul.msk.bf16.gmra.mxu1 %vm908_vm0, %v584_v19  ;;  %2114 = vmatmul.msk.bf16.gmra.mxu2 %vm908_vm0, %v1368_v38 }
 0x292   : > { %v1468_v14 = vadd.f32 %v1441_v31, %v1050_v23  ;;  %v1911_v20 = vmax.f32 %v1895_v46, 0.0 }
 0x295   : > { %v1849_v49 = vpop.f32.mrf.mxu3 }
 0x296   : > { %v1876_v9 = vadd.f32 %v1849_v49, %v1468_v14 }
 0x298   : > { %v1896_v51 = vadd.f32 %v3395_v25, %v1876_v9 }
 0x29a   : > { %v1912_v5 = vmax.f32 %v1896_v51, 0.0  ;;  %v2348_v10 = vpop.permute.xlu1 %2347 }
 0x29b   : > { %v2350_v21 = vunpack.i.h.bf16 %v2348_v10  ;;  %v2349_v11 = vunpack.i.l.bf16 %v2348_v10 }
 0x29c   : > { %v3586_v59 = vpack.c.bf16 %v1912_v5, %v1911_v20 }
 0x29d   : > { %v1768_v12 = vmax.f32 %v3516_v1, %v2350_v21  ;;  %v1767_v8 = vmax.f32 %v3520_v30, %v2349_v11 }
 0x29f   : > { %v1776_v60 = vpack.c.bf16 %v1768_v12, %v1767_v8 }
 0x2a1   : > { %2137 = vmatmul.msk.bf16.gmra.mxu3 %vm908_vm0, %v1776_v60 }
 0x2aa   : > { %v2358_v41 = vpop.permute.xlu0 %2357 }
 0x2ab   : > { %v2360_v3 = vunpack.i.h.bf16 %v2358_v41  ;;  %v2359_v4 = vunpack.i.l.bf16 %v2358_v41 }
 0x2ac   : > { %v1852_v50 = vpop.f32.mrf.mxu3 }
 0x2ad   : > { %v882_v2 = vmax.f32 %v3548_v13, %v2360_v3  ;;  %v881_v43 = vmax.f32 %v3546_v16, %v2359_v4 }
 0x2af   : > { %v890_v15 = vpack.c.bf16 %v882_v2, %v881_v43 }
 0x2b1   : > { %2075 = vmatmul.msk.bf16.gmra.mxu0 %vm908_vm0, %v890_v15  ;;  %v1927_v15 = vld [vmem:[%s3644_s4] sm:$0x1] }
 0x2b4   : > { %v1854_v6 = vpop.f32.mrf.mxu3 }
 0x2bd   : > { %v1444_v39 = vpop.f32.mrf.mxu2 }
 0x2bf   : > { %v1052_v57 = vpop.f32.mrf.mxu1  ;;  %v967_v48 = vpop.f32.mrf.mxu0 }
 0x2c0   : > { %v1053_v31 = vadd.f32 %v1052_v57, %v967_v48 }
 0x2c2   : > { %v1469_v5 = vadd.f32 %v1444_v39, %v1053_v31 }
 0x2c4   : > { %v1877_v12 = vadd.f32 %v1852_v50, %v1469_v5 }
 0x2c5   : > { %v1446_v1 = vpop.f32.mrf.mxu2 }
 0x2c6   : > { %v1897_v3 = vadd.f32 %v3395_v25, %v1877_v12 }
 0x2c7   : > { %v1054_v62 = vpop.f32.mrf.mxu1  ;;  %v969_v30 = vpop.f32.mrf.mxu0 }
 0x2c8   : > { %v1055_v47 = vadd.f32 %v1054_v62, %v969_v30  ;;  %v1913_v2 = vmax.f32 %v1897_v3, 0.0 }
 0x2ca   : > { %v1470_v9 = vadd.f32 %v1446_v1, %v1055_v47 }
 0x2cc   : > { %v1878_v21 = vadd.f32 %v1854_v6, %v1470_v9 }
 0x2cd   : > { %v1449_v61 = vpop.f32.mrf.mxu2 }
 0x2ce   : > { %v1898_v41 = vadd.f32 %v3395_v25, %v1878_v21 }
 0x2d0   : > { %v1914_v4 = vmax.f32 %v1898_v41, 0.0 }
 0x2d2   : > { %v1924_v43 = vpack.c.bf16 %v1914_v4, %v1913_v2 }
 0x2d5   : > { %v1451_v37 = vpop.f32.mrf.mxu2 }
 0x2de   : > { %v972_v18 = vpop.f32.mrf.mxu0 }
 0x2e6   : > { %v974_v13 = vpop.f32.mrf.mxu0 }
 0x2ee   : > { %v1057_v29 = vpop.f32.mrf.mxu1 }
 0x2ef   : > { %v1058_v45 = vadd.f32 %v1057_v29, %v972_v18 }
 0x2f1   : > { %v1471_v19 = vadd.f32 %v1449_v61, %v1058_v45 }
 0x2f4   : > { %v1857_v40 = vpop.f32.mrf.mxu3 }
 0x2f5   : > { %v1879_v14 = vadd.f32 %v1857_v40, %v1471_v19 }
 0x2f6   : > { %v1059_v35 = vpop.f32.mrf.mxu1 }
 0x2f7   : > { %v1060_v58 = vadd.f32 %v1059_v35, %v974_v13  ;;  %v1899_v10 = vadd.f32 %v3395_v25, %v1879_v14 }
 0x2f9   : > { %v1472_v63 = vadd.f32 %v1451_v37, %v1060_v58  ;;  %v1915_v8 = vmax.f32 %v1899_v10, 0.0 }
 0x2fc   : > { %v1859_v28 = vpop.f32.mrf.mxu3 }
 0x2fd   : > { %v1880_v38 = vadd.f32 %v1859_v28, %v1472_v63 }
 0x2ff   : > { %v1900_v51 = vadd.f32 %v3395_v25, %v1880_v38 }
 0x301   : > { %v1916_v11 = vmax.f32 %v1900_v51, 0.0 }
 0x303   : > { %v1925_v60 = vpack.c.bf16 %v1916_v11, %v1915_v8 }
 0x30e   : > { %v1062_v16 = vpop.f32.mrf.mxu1 }
 0x314   : > { %v1454_v52 = vpop.f32.mrf.mxu2 }
 0x316   : > { %v1064_v27 = vpop.f32.mrf.mxu1 }
 0x31c   : > { %v1456_v53 = vpop.f32.mrf.mxu2 }
 0x324   : > { %v1862_v22 = vpop.f32.mrf.mxu3 }
 0x32c   : > { %v1864_v44 = vpop.f32.mrf.mxu3 }
 0x32e   : > { %v977_v33 = vpop.f32.mrf.mxu0 }
 0x32f   : > { %v1063_v7 = vadd.f32 %v1062_v16, %v977_v33 }
 0x331   : > { %v1473_v55 = vadd.f32 %v1454_v52, %v1063_v7 }
 0x333   : > { %v1881_v26 = vadd.f32 %v1862_v22, %v1473_v55 }
 0x335   : > { %v1901_v34 = vadd.f32 %v3395_v25, %v1881_v26 }
 0x336   : > { %v979_v54 = vpop.f32.mrf.mxu0 }
 0x337   : > { %v1065_v0 = vadd.f32 %v1064_v27, %v979_v54  ;;  %v1917_v49 = vmax.f32 %v1901_v34, 0.0 }
 0x339   : > { %v1474_v36 = vadd.f32 %v1456_v53, %v1065_v0 }
 0x33b   : > { %v1882_v17 = vadd.f32 %v1864_v44, %v1474_v36 }
 0x33d   : > { %v1902_v23 = vadd.f32 %v3395_v25, %v1882_v17  ;;  %v1929_v25 = vstv %s1928_s27 }
 0x33f   : > { %v1918_v46 = vmax.f32 %v1902_v23, 0.0 }
 0x341   : > { %v1926_v20 = vpack.c.bf16 %v1918_v46, %v1917_v49 }
 0x343   : > { %1930 = vmatpush.bf16.xpose.msrb.mxu0 %v1926_v20 }
 0x34b   : > { %1931 = vmatpush.bf16.xpose.msrb.mxu0 %v1925_v60 }
 0x353   : > { %1932 = vmatpush.bf16.xpose.msrb.mxu0 %v1924_v43 }
 0x35b   : > { %1933 = vmatpush.bf16.xpose.msrb.mxu0 %v3586_v59 }
 0x363   : > { %1934 = vmatpush.bf16.xpose.msrb.mxu0 %v3570_v42 }
 0x36b   : > { %1935 = vmatpush.bf16.xpose.msrb.mxu0 %v3544_v56 }
 0x373   : > { %1936 = vmatpush.bf16.xpose.msrb.mxu0 %v3488_v32 }
 0x37b   : > { %1937 = vmatpush.bf16.xpose.msrb.mxu0 %v3426_v24 }
 0x382   : > { %1938 = vmatmul.bf16.vlgmr.msrb.gmra.mxu0 %v1927_v15 }
 0x3ff   : > { %v1939_v39 = vpop.f32.mrf.mxu0 }
 0x400   : > { %v1940_v57 = vadd.f32 %v1939_v39, %v1929_v25 }
 0x402   : > { %v2138_v59 = vmul.f32 -1.442695, %v1940_v57 }
 0x404   : > { %2362 = vpow2.f32 %v2138_v59 }
 0x407   : > { %v1941_v42 = vpop.f32.mrf.mxu0 }
 0x40a   : > { %v2363_v48 = vpop.eup %2362 }
 0x40b   : > { %v1946_v56 = vadd.f32 1.0, %v2363_v48 }
 0x40d   : > { %2364 = vrcp.f32 %v1946_v56  ;;  %v1958_v1 = vand.u32 2147483648, %v1946_v56  ;;  %v1956_v30 = vand.u32 2147483647, %v1946_v56  ;;  %vm1952_vm2 = vweird.f32 %v1946_v56 }
 0x40f   : > { %v1959_v29 = vor.u32 1.1754944e-38, %v1958_v1  ;;  %vm1957_vm4 = vcmp.eq.f32.partialorder %v1956_v30, 8.507059e+37 }
 0x413   : > { %v2365_v50 = vpop.eup %2364 }
 0x414   : > { %v1948_v32 = vmul.f32 %v2365_v50, %v1946_v56  ;;  %vm1953_vm1 = vweird.f32 %v2365_v50 }
 0x415   : > { %vm1954_vm3 = vmor %vm1952_vm2, %vm1953_vm1 }
 0x416   : > { %v1949_v24 = vsub.f32 1.0, %v1948_v32 }
 0x418   : > { %v1950_v62 = vmul.f32 %v2365_v50, %v1949_v24 }
 0x41a   : > { %v1951_v6 = vadd.f32 %v2365_v50, %v1950_v62 }
 0x41c   : > { %v1955_v61 = vsel %vm1954_vm3, %v2365_v50, %v1951_v6 }
 0x41d   : > { %v1960_v18 = vsel %vm1957_vm4, %v1959_v29, %v1955_v61 }
 0x41e   : > { %1962 = vst [vmem:[%s259_s13] sm:$0x1] %v1960_v18 }
 0x41f   : > { %2408 = shalt.err (!%p2405_p8)
}
 0x420   : > { %2153 = dma.vmem_to_hbm [thread:$0]  (%p2528_p5), %s1975_s14, 16, %s1977_s15, %s1964_s16  }
 0x421 PF: > { %p2165_p9 = scmp.ge.s32.totalorder %s2447_s26, 2  ;;  %s1988_s29 = sand.u32 1, %s2435_s23  }
 0x422   : > { %s1989_s27 = scalar_lea.sflag [#allocation4], %s1988_s29 }
 0x423   : > { %p2160_p10 = pnand %p2165_p9, %p2532_p6 }
 0x425   : > { %p2161_p11 = pneg %p2160_p10 }
 0x427   : > { %2430 = dma.done.wait (%p2161_p11), %s1989_s27, 16  }
 0x428   : > { %2432 = vsyncadd (%p2161_p11), %s1989_s27, 4294967280  ;;  %p18_p12 = scmp.ge.s32.totalorder %s2515_s28, 4   ;;  %s3655_s23 = smov %s2439_s24 }
 0x429   : > { %s3656_s24 = smov %s2443_s25  ;;  %s3657_s25 = smov %s2526_s7 }
 0x42a   : > { %s3658_s26 = smov %s2515_s28  ;;  %20 = sbr.rel (!%p18_p12) target bundleno = 6 (0x6), region = 87 }
 0x42f   :  { %1994 = vsyncpa [#allocation4], 1 }
 0x430   :  { %1996 = vsyncpa [#allocation4 + $0x1], 1 }
 0x431   :  { %1997 = vsyncpa [#allocation5], 1 }
 0x432   :  { %1999 = vsyncpa [#allocation5 + $0x1], 1 }

</bundles_post_ra>
